<compile_context>
chip_gen: v7x
topology: tpu7x:2x2x1
jax: 0.10.0
libtpu: 0.0.40
codegen_flags: <defaults>
</compile_context>

<pallas_src>
import jax
import jax.numpy as jnp
from jax.experimental import pallas as pl
from jax.experimental.pallas import tpu as pltpu

EPS = 1e-5
COUT_TILE = 80  # 240 / 80 = 3 blocks; multiple of 16 for bf16 weight sublanes


def fused_relu_conv1x1_bn_relu_kernel(x_ref, w_ref, gamma_ref, beta_ref, o_ref):
    # x_ref:     (Cin,  M)       f32  -- full activation slab, VMEM-resident
    # w_ref:     (COUT_TILE, Cin) bf16 -- 1x1 conv weight tile
    # gamma_ref: (COUT_TILE, 1)  f32
    # beta_ref:  (COUT_TILE, 1)  f32
    # o_ref:     (COUT_TILE, M)  f32
    xr = jnp.maximum(x_ref[...], 0.0).astype(jnp.bfloat16)      # relu12
    # conv2d15 (1x1, no bias): bf16 MXU matmul, f32 accumulate
    y = jnp.dot(w_ref[...], xr, preferred_element_type=jnp.float32)

    # batchnorm2d15 (training mode): biased per-channel stats over H*W.
    m = y.shape[-1]
    inv_m = 1.0 / m
    s1 = jnp.sum(y, axis=-1, keepdims=True)
    s2 = jnp.sum(y * y, axis=-1, keepdims=True)
    mean = s1 * inv_m
    var = jnp.maximum(s2 * inv_m - mean * mean, 0.0)             # guard tiny negatives
    inv_std = jax.lax.rsqrt(var + EPS)

    # Fold BN into one multiply-add per element.
    scale = inv_std * gamma_ref[...]                             # (COUT_TILE, 1)
    shift = beta_ref[...] - mean * scale                         # (COUT_TILE, 1)
    o_ref[...] = jnp.maximum(y * scale + shift, 0.0).astype(o_ref.dtype)  # relu13


def prepare_params(w_oihw, gamma, beta):
    """One-time parameter prep (hoisted out of the per-call forward path)."""
    cout, cin = w_oihw.shape[0], w_oihw.shape[1]
    w2d = jnp.asarray(w_oihw).reshape(cout, cin).astype(jnp.bfloat16)
    gamma2 = jnp.asarray(gamma).reshape(cout, 1).astype(jnp.float32)
    beta2 = jnp.asarray(beta).reshape(cout, 1).astype(jnp.float32)
    return w2d, gamma2, beta2


def module_forward(x_nchw, w2d, gamma2, beta2):
    N, C, H, W = x_nchw.shape
    assert N == 1, "kernel specialized to the module's N=1 input"
    Cout = w2d.shape[0]
    M = H * W
    assert Cout % COUT_TILE == 0
    n_blocks = Cout // COUT_TILE

    x2d = x_nchw.reshape(C, M)                                   # free view

    cost = pl.CostEstimate(
        flops=2 * M * C * Cout,
        transcendentals=0,
        bytes_accessed=(x2d.size * 4 + w2d.size * 2
                        + gamma2.size * 4 + beta2.size * 4
                        + Cout * M * 4),
    )

    out2d = pl.pallas_call(
        fused_relu_conv1x1_bn_relu_kernel,
        out_shape=jax.ShapeDtypeStruct((Cout, M), jnp.float32),
        grid=(n_blocks,),
        in_specs=[
            # Activations: same block every step -> stays resident in VMEM.
            pl.BlockSpec((C, M), lambda i: (0, 0)),
            # Weight / BN params: tiled over Cout, pipelined behind compute.
            pl.BlockSpec((COUT_TILE, C), lambda i: (i, 0)),
            pl.BlockSpec((COUT_TILE, 1), lambda i: (i, 0)),
            pl.BlockSpec((COUT_TILE, 1), lambda i: (i, 0)),
        ],
        out_specs=pl.BlockSpec((COUT_TILE, M), lambda i: (i, 0)),
        compiler_params=pltpu.CompilerParams(
            dimension_semantics=("parallel",)),
        cost_estimate=cost,
    )(x2d, w2d, gamma2, beta2)

    # (Cout, M) -> (1, Cout, H, W): free view, NCHW-native result.
    return out2d.reshape(1, Cout, H, W)


if __name__ == "__main__":
    key = jax.random.PRNGKey(0)
    kx, kw = jax.random.split(key)

    N, C, H, W = 1, 240, 28, 28          # module: Conv2d(240 -> 240, 1x1)
    x = jax.random.normal(kx, (N, C, H, W), dtype=jnp.float32)

    # Deterministic synthetic parameters matching PyTorch shapes.
    conv_w = jax.random.normal(kw, (240, 240, 1, 1), dtype=jnp.float32) * 0.05
    bn_gamma = jnp.ones((240,), dtype=jnp.float32)   # BN affine weight init
    bn_beta = jnp.zeros((240,), dtype=jnp.float32)   # BN affine bias init

    # Parameter prep done once, outside the forward path.
    w2d, gamma2, beta2 = prepare_params(conv_w, bn_gamma, bn_beta)
    w2d, gamma2, beta2 = jax.device_put((w2d, gamma2, beta2))

    fwd = jax.jit(module_forward)
    out = fwd(x, w2d, gamma2, beta2)
    jax.block_until_ready(out)

    assert out.shape == (N, 240, H, W)
    assert bool(jnp.all(out >= 0.0))      # final ReLU invariant
    assert bool(jnp.all(jnp.isfinite(out)))
    print("KERNEL_OK")
</pallas_src>

<mosaic_0001>
module attributes {stable_mosaic.version = 11 : i64} {
  func.func @fused_relu_conv1x1_bn_relu_kernel(%arg0: i32, %arg1: memref<240x784xf32, #tpu.memory_space<vmem>>, %arg2: memref<80x240xbf16, #tpu.memory_space<vmem>>, %arg3: memref<80x1xf32, #tpu.memory_space<vmem>>, %arg4: memref<80x1xf32, #tpu.memory_space<vmem>>, %arg5: memref<80x784xf32, #tpu.memory_space<vmem>>) attributes {dimension_semantics = [#tpu.dimension_semantics<parallel>], iteration_bounds = array<i64: 3>, scalar_prefetch = 0 : i64, scratch_operands = 0 : i64, tpu.core_type = #tpu.core_type<tc>, window_params = [{pipeline_mode = #tpu.pipeline_mode<synchronous>, transform_indices = @transform_0, window_bounds = array<i64: 240, 784>}, {transform_indices = @transform_1, window_bounds = array<i64: 80, 240>}, {transform_indices = @transform_2, window_bounds = array<i64: 80, 1>}, {transform_indices = @transform_3, window_bounds = array<i64: 80, 1>}, {transform_indices = @transform_4, window_bounds = array<i64: 80, 784>}]} {
    %c0 = arith.constant 0 : index
    %c0_0 = arith.constant 0 : index
    %0 = vector.load %arg1[%c0, %c0_0] : memref<240x784xf32, #tpu.memory_space<vmem>>, vector<240x784xf32>
    %cst = arith.constant 0.000000e+00 : f32
    %1 = vector.broadcast %cst : f32 to vector<240x784xf32>
    %2 = arith.maximumf %0, %1 : vector<240x784xf32>
    %3 = arith.truncf %2 : vector<240x784xf32> to vector<240x784xbf16>
    %c0_1 = arith.constant 0 : index
    %c0_2 = arith.constant 0 : index
    %4 = vector.load %arg2[%c0_1, %c0_2] : memref<80x240xbf16, #tpu.memory_space<vmem>>, vector<80x240xbf16>
    %cst_3 = arith.constant dense<0.000000e+00> : vector<80x784xf32>
    %5 = tpu.matmul %4, %3, %cst_3 {dimension_numbers = #tpu.dot_dimension_numbers<[1], [0], [0], [1], [0, 0, 1, 1], [], []>} : vector<80x240xbf16>, vector<240x784xbf16>, vector<80x784xf32> -> vector<80x784xf32>
    %cst_4 = arith.constant dense<0.000000e+00> : vector<80xf32>
    %6 = vector.multi_reduction <add>, %5, %cst_4 [1] : vector<80x784xf32> to vector<80xf32>
    %7 = vector.shape_cast %6 : vector<80xf32> to vector<80x1xf32>
    %8 = arith.mulf %5, %5 : vector<80x784xf32>
    %cst_5 = arith.constant dense<0.000000e+00> : vector<80xf32>
    %9 = vector.multi_reduction <add>, %8, %cst_5 [1] : vector<80x784xf32> to vector<80xf32>
    %10 = vector.shape_cast %9 : vector<80xf32> to vector<80x1xf32>
    %cst_6 = arith.constant 0.00127551018 : f32
    %11 = vector.broadcast %cst_6 : f32 to vector<80x1xf32>
    %12 = arith.mulf %7, %11 : vector<80x1xf32>
    %cst_7 = arith.constant 0.00127551018 : f32
    %13 = vector.broadcast %cst_7 : f32 to vector<80x1xf32>
    %14 = arith.mulf %10, %13 : vector<80x1xf32>
    %15 = arith.mulf %12, %12 : vector<80x1xf32>
    %16 = arith.subf %14, %15 : vector<80x1xf32>
    %cst_8 = arith.constant 0.000000e+00 : f32
    %17 = vector.broadcast %cst_8 : f32 to vector<80x1xf32>
    %18 = arith.maximumf %16, %17 : vector<80x1xf32>
    %cst_9 = arith.constant 9.99999974E-6 : f32
    %19 = vector.broadcast %cst_9 : f32 to vector<80x1xf32>
    %20 = arith.addf %18, %19 : vector<80x1xf32>
    %21 = math.rsqrt %20 : vector<80x1xf32>
    %c0_10 = arith.constant 0 : index
    %c0_11 = arith.constant 0 : index
    %22 = vector.load %arg3[%c0_10, %c0_11] : memref<80x1xf32, #tpu.memory_space<vmem>>, vector<80x1xf32>
    %23 = arith.mulf %21, %22 : vector<80x1xf32>
    %c0_12 = arith.constant 0 : index
    %c0_13 = arith.constant 0 : index
    %24 = vector.load %arg4[%c0_12, %c0_13] : memref<80x1xf32, #tpu.memory_space<vmem>>, vector<80x1xf32>
    %25 = arith.mulf %12, %23 : vector<80x1xf32>
    %26 = arith.subf %24, %25 : vector<80x1xf32>
    %27 = vector.broadcast %23 : vector<80x1xf32> to vector<80x784xf32>
    %28 = arith.mulf %5, %27 : vector<80x784xf32>
    %29 = vector.broadcast %26 : vector<80x1xf32> to vector<80x784xf32>
    %30 = arith.addf %28, %29 : vector<80x784xf32>
    %cst_14 = arith.constant 0.000000e+00 : f32
    %31 = vector.broadcast %cst_14 : f32 to vector<80x784xf32>
    %32 = arith.maximumf %30, %31 : vector<80x784xf32>
    %c0_15 = arith.constant 0 : index
    %c0_16 = arith.constant 0 : index
    %33 = vector.load %arg5[%c0_15, %c0_16] : memref<80x784xf32, #tpu.memory_space<vmem>>, vector<80x784xf32>
    tpu.vector_store %arg5[%c0_15, %c0_16], %32 {strides = array<i32>} : memref<80x784xf32, #tpu.memory_space<vmem>>, vector<80x784xf32>,
    return
  }
  func.func @transform_0(%arg0: i32) -> (i32, i32) {
    %c0_i32 = arith.constant 0 : i32
    %c0_i32_0 = arith.constant 0 : i32
    %c0_i32_1 = arith.constant 0 : i32
    return %c0_i32, %c0_i32_0 : i32, i32
  }
  func.func @transform_1(%arg0: i32) -> (i32, i32) {
    %c0_i32 = arith.constant 0 : i32
    %c0_i32_0 = arith.constant 0 : i32
    return %arg0, %c0_i32 : i32, i32
  }
  func.func @transform_2(%arg0: i32) -> (i32, i32) {
    %c0_i32 = arith.constant 0 : i32
    %c0_i32_0 = arith.constant 0 : i32
    return %arg0, %c0_i32 : i32, i32
  }
  func.func @transform_3(%arg0: i32) -> (i32, i32) {
    %c0_i32 = arith.constant 0 : i32
    %c0_i32_0 = arith.constant 0 : i32
    return %arg0, %c0_i32 : i32, i32
  }
  func.func @transform_4(%arg0: i32) -> (i32, i32) {
    %c0_i32 = arith.constant 0 : i32
    %c0_i32_0 = arith.constant 0 : i32
    return %arg0, %c0_i32 : i32, i32
  }
}

</mosaic_0001>

<bundles_post_ra>
// kernel: module_forward.1
= control target key start
LH: loop header
LB: loop body
LE: loop exit
PB: predicated region body
PF: predicated region fallthrough
CT: control target
= control target key end

     0   :  { %s2126_s15 = smov 0   ;;  %s3575_s0 = inlined_call_operand.vmem [shape: f32[240,784], index: 0, kind: input, shape index: {}]   ;;  %s3576_s1 = inlined_call_operand.vmem [shape: bf16[240,240], index: 1, kind: input, shape index: {}]   ;;  %s3577_s2 = inlined_call_operand.vmem [shape: f32[240,1], index: 2, kind: input, shape index: {}]   ;;  %s3578_s3 = inlined_call_operand.vmem [shape: f32[240,1], index: 3, kind: input, shape index: {}]   ;;  %s3579_s4 = inlined_call_operand.vmem [shape: f32[240,784], index: 4, kind: output, shape index: {}]  }
   0x1 LB: > { %s2002_s16 = sadd.s32 4294967295, %s2098_s15   ;;  %p2006_p0 = scmp.ge.s32.totalorder %s2098_s15, 1  ;;  %s2098_s15 = sphi %s2126_s15, %s14_s15  }
   0x2   : > { %p186_p1 = scmp.lt.s32.totalorder %s2098_s15, 4 }
   0x4   : > { %p187_p2 = pnand %p2006_p0, %p186_p1 }
   0x6   : > { %190 = sbr.rel (%p187_p2) target bundleno = 715 (0x2cb), region = 36 }
   0xd   : > { %v252_v0 = vld [vmem:[%s3575_s0 + $0x8] sm:$0xff]  ;;  %v259_v1 = vld [vmem:[%s3575_s0 + $0x40] sm:$0xff]  ;;  %v254_v2 = vld [vmem:[%s3575_s0 + $0x18] sm:$0xff]  ;;  %v2100_v9 = vmov 0   ;;  %s2318_s17 = smul.u32 10, %s2002_s16  ;;  %vm831_vm0 = vcmask 916480  }
   0xe   : > { %v462_v3 = vmax.f32 %v252_v0, 0.0  ;;  %v469_v4 = vmax.f32 %v259_v1, 0.0  ;;  %v261_v5 = vld [vmem:[%s3575_s0 + $0x50] sm:$0xff]  ;;  %v464_v6 = vmax.f32 %v254_v2, 0.0  ;;  %v251_v7 = vld [vmem:[%s3575_s0] sm:$0xff]  ;;  %v258_v8 = vld [vmem:[%s3575_s0 + $0x38] sm:$0xff]  ;;  %2056 = vset.pattern.permute.xlu1 %v2100_v9  ;;  %2055 = vset.pattern.permute.xlu0 %v2100_v9 }
   0xf   : > { %v471_v10 = vmax.f32 %v261_v5, 0.0  ;;  %v461_v11 = vmax.f32 %v251_v7, 0.0  ;;  %v468_v12 = vmax.f32 %v258_v8, 0.0  ;;  %v253_v13 = vld [vmem:[%s3575_s0 + $0x10] sm:$0xff]  ;;  %v260_v14 = vld [vmem:[%s3575_s0 + $0x48] sm:$0xff]  ;;  %v266_v15 = vld [vmem:[%s3575_s0 + $0x78] sm:$0xff] }
  0x10   : > { %v672_v16 = vpack.c.bf16 %v469_v4, %v462_v3  ;;  %v463_v17 = vmax.f32 %v253_v13, 0.0  ;;  %v470_v18 = vmax.f32 %v260_v14, 0.0  ;;  %v273_v19 = vld [vmem:[%s3575_s0 + $0xb0] sm:$0xff]  ;;  %v476_v20 = vmax.f32 %v266_v15, 0.0  ;;  %v268_v21 = vld [vmem:[%s3575_s0 + $0x88] sm:$0xff]  ;;  %v275_v22 = vld [vmem:[%s3575_s0 + $0xc0] sm:$0xff] }
  0x11   : > { %v674_v23 = vpack.c.bf16 %v471_v10, %v464_v6  ;;  %v671_v24 = vpack.c.bf16 %v468_v12, %v461_v11  ;;  %v483_v25 = vmax.f32 %v273_v19, 0.0  ;;  %v478_v26 = vmax.f32 %v268_v21, 0.0  ;;  %v265_v27 = vld [vmem:[%s3575_s0 + $0x70] sm:$0xff]  ;;  %v272_v28 = vld [vmem:[%s3575_s0 + $0xa8] sm:$0xff]  ;;  %v267_v29 = vld [vmem:[%s3575_s0 + $0x80] sm:$0xff]  ;;  %p225_p3 = scmp.lt.s32.totalorder %s2318_s17, 29 }
  0x12   : > { %847 = vmatprep.subr.bf16.mxu0 %v672_v16  ;;  %v673_v30 = vpack.c.bf16 %v470_v18, %v463_v17  ;;  %v485_v31 = vmax.f32 %v275_v22, 0.0  ;;  %v475_v32 = vmax.f32 %v265_v27, 0.0  ;;  %v482_v33 = vmax.f32 %v272_v28, 0.0  ;;  %v274_v34 = vld [vmem:[%s3575_s0 + $0xb8] sm:$0xff]  ;;  %v280_v35 = vld [vmem:[%s3575_s0 + $0xe8] sm:$0xff]  ;;  %v287_v36 = vld [vmem:[%s3575_s0 + $0x120] sm:$0xff] }
  0x13   : > { %930 = vmatprep.subr.bf16.mxu1 %v674_v23  ;;  %848 = vmatpush1.bf16.msra.mxu0 %v671_v24  ;;  %v679_v37 = vpack.c.bf16 %v483_v25, %v476_v20  ;;  %v477_v38 = vmax.f32 %v267_v29, 0.0  ;;  %v484_v39 = vmax.f32 %v274_v34, 0.0  ;;  %v490_v40 = vmax.f32 %v280_v35, 0.0  ;;  %v282_v41 = vld [vmem:[%s3575_s0 + $0xf8] sm:$0xff]  ;;  %v289_v42 = vld [vmem:[%s3575_s0 + $0x130] sm:$0xff]  ;;  %v279_v43 = vld [vmem:[%s3575_s0 + $0xe0] sm:$0xff] }
  0x14   : > { %931 = vmatpush1.bf16.msra.mxu1 %v673_v30  ;;  %v681_v44 = vpack.c.bf16 %v485_v31, %v478_v26  ;;  %v678_v45 = vpack.c.bf16 %v482_v33, %v475_v32  ;;  %v497_v46 = vmax.f32 %v287_v36, 0.0  ;;  %v492_v47 = vmax.f32 %v282_v41, 0.0  ;;  %v286_v48 = vld [vmem:[%s3575_s0 + $0x118] sm:$0xff]  ;;  %v281_v49 = vld [vmem:[%s3575_s0 + $0xf0] sm:$0xff]  ;;  %v288_v50 = vld [vmem:[%s3575_s0 + $0x128] sm:$0xff]  ;;  %s3689_s17 = smov (!%p225_p3, %s2318_s17), 29 }
  0x15   : > { %849 = vmatprep.subr.bf16.mxu0 %v679_v37  ;;  %v680_v51 = vpack.c.bf16 %v484_v39, %v477_v38  ;;  %v499_v52 = vmax.f32 %v289_v42, 0.0  ;;  %v489_v53 = vmax.f32 %v279_v43, 0.0  ;;  %v496_v54 = vmax.f32 %v286_v48, 0.0  ;;  %v294_v55 = vld [vmem:[%s3575_s0 + $0x158] sm:$0xff]  ;;  %v301_v56 = vld [vmem:[%s3575_s0 + $0x190] sm:$0xff]  ;;  %v296_v57 = vld [vmem:[%s3575_s0 + $0x168] sm:$0xff] }
  0x16   : > { %932 = vmatprep.subr.bf16.mxu1 %v681_v44  ;;  %v686_v58 = vpack.c.bf16 %v497_v46, %v490_v40  ;;  %v491_v59 = vmax.f32 %v281_v49, 0.0  ;;  %v498_v60 = vmax.f32 %v288_v50, 0.0  ;;  %v504_v61 = vmax.f32 %v294_v55, 0.0  ;;  %v303_v62 = vld [vmem:[%s3575_s0 + $0x1a0] sm:$0xff]  ;;  %v293_v63 = vld [vmem:[%s3575_s0 + $0x150] sm:$0xff]  ;;  %v300_v0 = vld [vmem:[%s3575_s0 + $0x188] sm:$0xff] }
  0x17   : > { %850 = vmatpush1.bf16.msra.mxu0 %v678_v45  ;;  %v688_v1 = vpack.c.bf16 %v499_v52, %v492_v47  ;;  %v685_v2 = vpack.c.bf16 %v496_v54, %v489_v53  ;;  %v511_v3 = vmax.f32 %v301_v56, 0.0  ;;  %v506_v4 = vmax.f32 %v296_v57, 0.0  ;;  %v295_v5 = vld [vmem:[%s3575_s0 + $0x160] sm:$0xff]  ;;  %v302_v6 = vld [vmem:[%s3575_s0 + $0x198] sm:$0xff]  ;;  %v308_v7 = vld [vmem:[%s3575_s0 + $0x1c8] sm:$0xff]  ;;  %s2399_s18 = sshll.u32 %s3689_s17, 3 }
  0x18   : > { %933 = vmatpush1.bf16.msra.mxu1 %v680_v51  ;;  %851 = vmatprep.subr.bf16.mxu0 %v686_v58  ;;  %v687_v8 = vpack.c.bf16 %v498_v60, %v491_v59  ;;  %v513_v10 = vmax.f32 %v303_v62, 0.0  ;;  %v503_v11 = vmax.f32 %v293_v63, 0.0  ;;  %v510_v12 = vmax.f32 %v300_v0, 0.0  ;;  %v315_v13 = vld [vmem:[%s3575_s0 + $0x200] sm:$0xff]  ;;  %v310_v14 = vld [vmem:[%s3575_s0 + $0x1d8] sm:$0xff]  ;;  %v317_v15 = vld [vmem:[%s3575_s0 + $0x210] sm:$0xff]  ;;  %s2432_s12 = scalar_lea.vmem %s3576_s1, %s2399_s18  ;;  %s3338_s29 = scalar_lea.vmem %s3577_s2, %s2399_s18 }
  0x19   : > { %934 = vmatprep.subr.bf16.mxu1 %v688_v1  ;;  %v693_v16 = vpack.c.bf16 %v511_v3, %v504_v61  ;;  %v505_v17 = vmax.f32 %v295_v5, 0.0  ;;  %v512_v18 = vmax.f32 %v302_v6, 0.0  ;;  %v518_v19 = vmax.f32 %v308_v7, 0.0  ;;  %v307_v20 = vld [vmem:[%s3575_s0 + $0x1c0] sm:$0xff]  ;;  %v314_v21 = vld [vmem:[%s3575_s0 + $0x1f8] sm:$0xff]  ;;  %v309_v22 = vld [vmem:[%s3575_s0 + $0x1d0] sm:$0xff]  ;;  %s3352_s6 = scalar_lea.vmem %s3578_s3, %s2399_s18 }
  0x1a   : > { %v695_v23 = vpack.c.bf16 %v513_v10, %v506_v4  ;;  %v692_v24 = vpack.c.bf16 %v510_v12, %v503_v11  ;;  %v525_v25 = vmax.f32 %v315_v13, 0.0  ;;  %v520_v26 = vmax.f32 %v310_v14, 0.0  ;;  %v316_v27 = vld [vmem:[%s3575_s0 + $0x208] sm:$0xff]  ;;  %v322_v28 = vld [vmem:[%s3575_s0 + $0x238] sm:$0xff]  ;;  %v329_v29 = vld [vmem:[%s3575_s0 + $0x270] sm:$0xff]  ;;  %s2045_s18 = smul.u32 56, %s3689_s17 }
  0x1b   : > { %852 = vmatpush1.bf16.msra.mxu0 %v685_v2  ;;  %v694_v30 = vpack.c.bf16 %v512_v18, %v505_v17  ;;  %v527_v31 = vmax.f32 %v317_v15, 0.0  ;;  %v517_v32 = vmax.f32 %v307_v20, 0.0  ;;  %v524_v33 = vmax.f32 %v314_v21, 0.0  ;;  %v324_v34 = vld [vmem:[%s3575_s0 + $0x248] sm:$0xff]  ;;  %v331_v35 = vld [vmem:[%s3575_s0 + $0x280] sm:$0xff]  ;;  %v321_v36 = vld [vmem:[%s3575_s0 + $0x230] sm:$0xff] }
  0x1c   : > { %935 = vmatpush1.bf16.msra.mxu1 %v687_v8  ;;  %853 = vmatprep.subr.bf16.mxu0 %v693_v16  ;;  %v700_v37 = vpack.c.bf16 %v525_v25, %v518_v19  ;;  %v519_v38 = vmax.f32 %v309_v22, 0.0  ;;  %v526_v39 = vmax.f32 %v316_v27, 0.0  ;;  %v532_v40 = vmax.f32 %v322_v28, 0.0  ;;  %v328_v41 = vld [vmem:[%s3575_s0 + $0x268] sm:$0xff]  ;;  %v323_v42 = vld [vmem:[%s3575_s0 + $0x240] sm:$0xff]  ;;  %v330_v43 = vld [vmem:[%s3575_s0 + $0x278] sm:$0xff]  ;;  %s3410_s8 = scalar_lea.vmem %s3579_s4, %s2045_s18 }
  0x1d   : > { %936 = vmatprep.subr.bf16.mxu1 %v695_v23  ;;  %v702_v44 = vpack.c.bf16 %v527_v31, %v520_v26  ;;  %v539_v45 = vmax.f32 %v329_v29, 0.0  ;;  %v534_v46 = vmax.f32 %v324_v34, 0.0  ;;  %v336_v47 = vld [vmem:[%s3575_s0 + $0x2a8] sm:$0xff]  ;;  %v343_v48 = vld [vmem:[%s3575_s0 + $0x2e0] sm:$0xff]  ;;  %v699_v49 = vpack.c.bf16 %v524_v33, %v517_v32  ;;  %v338_v51 = vld [vmem:[%s3575_s0 + $0x2b8] sm:$0xff] }
  0x1e   : > { %v541_v50 = vmax.f32 %v331_v35, 0.0  ;;  %v345_v52 = vld [vmem:[%s3575_s0 + $0x2f0] sm:$0xff]  ;;  %v531_v53 = vmax.f32 %v321_v36, 0.0  ;;  %v538_v54 = vmax.f32 %v328_v41, 0.0  ;;  %v533_v55 = vmax.f32 %v323_v42, 0.0  ;;  %v335_v57 = vld [vmem:[%s3575_s0 + $0x2a0] sm:$0xff] }
  0x1f   : > { %854 = vmatpush1.bf16.msra.mxu0 %v692_v24  ;;  %v540_v56 = vmax.f32 %v330_v43, 0.0  ;;  %v342_v58 = vld [vmem:[%s3575_s0 + $0x2d8] sm:$0xff]  ;;  %v701_v59 = vpack.c.bf16 %v526_v39, %v519_v38  ;;  %v707_v60 = vpack.c.bf16 %v539_v45, %v532_v40  ;;  %v546_v61 = vmax.f32 %v336_v47, 0.0  ;;  %v337_v63 = vld [vmem:[%s3575_s0 + $0x2b0] sm:$0xff]  ;;  %v344_v3 = vld [vmem:[%s3575_s0 + $0x2e8] sm:$0xff] }
  0x20   : > { %937 = vmatpush1.bf16.msra.mxu1 %v694_v30  ;;  %855 = vmatprep.subr.bf16.mxu0 %v700_v37  ;;  %v553_v62 = vmax.f32 %v343_v48, 0.0  ;;  %v709_v0 = vpack.c.bf16 %v541_v50, %v534_v46  ;;  %v548_v1 = vmax.f32 %v338_v51, 0.0  ;;  %v555_v2 = vmax.f32 %v345_v52, 0.0  ;;  %v350_v4 = vld [vmem:[%s3575_s0 + $0x318] sm:$0xff]  ;;  %v357_v5 = vld [vmem:[%s3575_s0 + $0x350] sm:$0xff]  ;;  %v352_v8 = vld [vmem:[%s3575_s0 + $0x328] sm:$0xff] }
  0x21   : > { %938 = vmatprep.subr.bf16.mxu1 %v702_v44  ;;  %v545_v6 = vmax.f32 %v335_v57, 0.0  ;;  %v552_v7 = vmax.f32 %v342_v58, 0.0  ;;  %v359_v10 = vld [vmem:[%s3575_s0 + $0x360] sm:$0xff]  ;;  %v706_v11 = vpack.c.bf16 %v538_v54, %v531_v53  ;;  %v708_v12 = vpack.c.bf16 %v540_v56, %v533_v55  ;;  %v349_v14 = vld [vmem:[%s3575_s0 + $0x310] sm:$0xff]  ;;  %v356_v15 = vld [vmem:[%s3575_s0 + $0x348] sm:$0xff] }
  0x22   : > { %v547_v13 = vmax.f32 %v337_v63, 0.0  ;;  %v351_v16 = vld [vmem:[%s3575_s0 + $0x320] sm:$0xff]  ;;  %v714_v17 = vpack.c.bf16 %v553_v62, %v546_v61  ;;  %v554_v18 = vmax.f32 %v344_v3, 0.0  ;;  %v560_v19 = vmax.f32 %v350_v4, 0.0  ;;  %v358_v21 = vld [vmem:[%s3575_s0 + $0x358] sm:$0xff]  ;;  %v364_v22 = vld [vmem:[%s3575_s0 + $0x388] sm:$0xff] }
  0x23   : > { %856 = vmatpush1.bf16.msra.mxu0 %v699_v49  ;;  %v567_v20 = vmax.f32 %v357_v5, 0.0  ;;  %v371_v23 = vld [vmem:[%s3575_s0 + $0x3c0] sm:$0xff]  ;;  %v716_v24 = vpack.c.bf16 %v555_v2, %v548_v1  ;;  %v562_v25 = vmax.f32 %v352_v8, 0.0  ;;  %v569_v26 = vmax.f32 %v359_v10, 0.0  ;;  %v366_v30 = vld [vmem:[%s3575_s0 + $0x398] sm:$0xff]  ;;  %v373_v31 = vld [vmem:[%s3575_s0 + $0x3d0] sm:$0xff] }
  0x24   : > { %939 = vmatpush1.bf16.msra.mxu1 %v701_v59  ;;  %857 = vmatprep.subr.bf16.mxu0 %v707_v60  ;;  %v713_v27 = vpack.c.bf16 %v552_v7, %v545_v6  ;;  %v559_v28 = vmax.f32 %v349_v14, 0.0  ;;  %v566_v29 = vmax.f32 %v356_v15, 0.0  ;;  %v561_v32 = vmax.f32 %v351_v16, 0.0  ;;  %v363_v36 = vld [vmem:[%s3575_s0 + $0x380] sm:$0xff]  ;;  %v370_v37 = vld [vmem:[%s3575_s0 + $0x3b8] sm:$0xff]  ;;  %v365_v40 = vld [vmem:[%s3575_s0 + $0x390] sm:$0xff] }
  0x25   : > { %940 = vmatprep.subr.bf16.mxu1 %v709_v0  ;;  %v568_v33 = vmax.f32 %v358_v21, 0.0  ;;  %v574_v34 = vmax.f32 %v364_v22, 0.0  ;;  %v581_v35 = vmax.f32 %v371_v23, 0.0  ;;  %v715_v38 = vpack.c.bf16 %v554_v18, %v547_v13  ;;  %v372_v44 = vld [vmem:[%s3575_s0 + $0x3c8] sm:$0xff]  ;;  %v378_v45 = vld [vmem:[%s3575_s0 + $0x3f8] sm:$0xff]  ;;  %v385_v46 = vld [vmem:[%s3575_s0 + $0x430] sm:$0xff] }
  0x26   : > { %v721_v39 = vpack.c.bf16 %v567_v20, %v560_v19  ;;  %v723_v41 = vpack.c.bf16 %v569_v26, %v562_v25  ;;  %v576_v42 = vmax.f32 %v366_v30, 0.0  ;;  %v583_v43 = vmax.f32 %v373_v31, 0.0  ;;  %v380_v49 = vld [vmem:[%s3575_s0 + $0x408] sm:$0xff]  ;;  %v387_v50 = vld [vmem:[%s3575_s0 + $0x440] sm:$0xff]  ;;  %v377_v51 = vld [vmem:[%s3575_s0 + $0x3f0] sm:$0xff] }
  0x27   : > { %858 = vmatpush1.bf16.msra.mxu0 %v706_v11  ;;  %v573_v47 = vmax.f32 %v363_v36, 0.0  ;;  %v580_v48 = vmax.f32 %v370_v37, 0.0  ;;  %v720_v52 = vpack.c.bf16 %v566_v29, %v559_v28  ;;  %v722_v53 = vpack.c.bf16 %v568_v33, %v561_v32  ;;  %v384_v55 = vld [vmem:[%s3575_s0 + $0x428] sm:$0xff]  ;;  %v379_v56 = vld [vmem:[%s3575_s0 + $0x400] sm:$0xff]  ;;  %v386_v57 = vld [vmem:[%s3575_s0 + $0x438] sm:$0xff] }
  0x28   : > { %941 = vmatpush1.bf16.msra.mxu1 %v708_v12  ;;  %859 = vmatprep.subr.bf16.mxu0 %v714_v17  ;;  %v728_v54 = vpack.c.bf16 %v581_v35, %v574_v34  ;;  %v575_v58 = vmax.f32 %v365_v40, 0.0  ;;  %v582_v59 = vmax.f32 %v372_v44, 0.0  ;;  %v588_v60 = vmax.f32 %v378_v45, 0.0  ;;  %v392_v62 = vld [vmem:[%s3575_s0 + $0x468] sm:$0xff]  ;;  %v399_v63 = vld [vmem:[%s3575_s0 + $0x4a0] sm:$0xff]  ;;  %v394_v6 = vld [vmem:[%s3575_s0 + $0x478] sm:$0xff] }
  0x29   : > { %942 = vmatprep.subr.bf16.mxu1 %v716_v24  ;;  %v595_v61 = vmax.f32 %v385_v46, 0.0  ;;  %v730_v0 = vpack.c.bf16 %v583_v43, %v576_v42  ;;  %v590_v1 = vmax.f32 %v380_v49, 0.0  ;;  %v597_v2 = vmax.f32 %v387_v50, 0.0  ;;  %v401_v7 = vld [vmem:[%s3575_s0 + $0x4b0] sm:$0xff]  ;;  %v391_v13 = vld [vmem:[%s3575_s0 + $0x460] sm:$0xff]  ;;  %v398_v14 = vld [vmem:[%s3575_s0 + $0x498] sm:$0xff] }
  0x2a   : > { %v727_v3 = vpack.c.bf16 %v580_v48, %v573_v47  ;;  %v587_v4 = vmax.f32 %v377_v51, 0.0  ;;  %v594_v5 = vmax.f32 %v384_v55, 0.0  ;;  %v589_v8 = vmax.f32 %v379_v56, 0.0  ;;  %v393_v17 = vld [vmem:[%s3575_s0 + $0x470] sm:$0xff]  ;;  %v400_v21 = vld [vmem:[%s3575_s0 + $0x4a8] sm:$0xff]  ;;  %v406_v22 = vld [vmem:[%s3575_s0 + $0x4d8] sm:$0xff] }
  0x2b   : > { %860 = vmatpush1.bf16.msra.mxu0 %v713_v27  ;;  %v596_v10 = vmax.f32 %v386_v57, 0.0  ;;  %v602_v11 = vmax.f32 %v392_v62, 0.0  ;;  %v609_v12 = vmax.f32 %v399_v63, 0.0  ;;  %v729_v15 = vpack.c.bf16 %v582_v59, %v575_v58  ;;  %v413_v23 = vld [vmem:[%s3575_s0 + $0x510] sm:$0xff]  ;;  %v408_v26 = vld [vmem:[%s3575_s0 + $0x4e8] sm:$0xff]  ;;  %v415_v27 = vld [vmem:[%s3575_s0 + $0x520] sm:$0xff] }
  0x2c   : > { %943 = vmatpush1.bf16.msra.mxu1 %v715_v38  ;;  %861 = vmatprep.subr.bf16.mxu0 %v721_v39  ;;  %v735_v16 = vpack.c.bf16 %v595_v61, %v588_v60  ;;  %v737_v18 = vpack.c.bf16 %v597_v2, %v590_v1  ;;  %v604_v19 = vmax.f32 %v394_v6, 0.0  ;;  %v611_v20 = vmax.f32 %v401_v7, 0.0  ;;  %v405_v28 = vld [vmem:[%s3575_s0 + $0x4d0] sm:$0xff]  ;;  %v412_v32 = vld [vmem:[%s3575_s0 + $0x508] sm:$0xff]  ;;  %v407_v33 = vld [vmem:[%s3575_s0 + $0x4e0] sm:$0xff] }
  0x2d   : > { %944 = vmatprep.subr.bf16.mxu1 %v723_v41  ;;  %v601_v24 = vmax.f32 %v391_v13, 0.0  ;;  %v608_v25 = vmax.f32 %v398_v14, 0.0  ;;  %v734_v29 = vpack.c.bf16 %v594_v5, %v587_v4  ;;  %v736_v30 = vpack.c.bf16 %v596_v10, %v589_v8  ;;  %v414_v34 = vld [vmem:[%s3575_s0 + $0x518] sm:$0xff]  ;;  %v420_v39 = vld [vmem:[%s3575_s0 + $0x548] sm:$0xff]  ;;  %v427_v40 = vld [vmem:[%s3575_s0 + $0x580] sm:$0xff] }
  0x2e   : > { %v742_v31 = vpack.c.bf16 %v609_v12, %v602_v11  ;;  %v603_v35 = vmax.f32 %v393_v17, 0.0  ;;  %v610_v36 = vmax.f32 %v400_v21, 0.0  ;;  %v616_v37 = vmax.f32 %v406_v22, 0.0  ;;  %v2450_v44 = vld [vmem:[%s2432_s12 + $0x4] ss:$8 sps:$4 sm:$0xff]   ;;  %v422_v48 = vld [vmem:[%s3575_s0 + $0x558] sm:$0xff] }
  0x2f   : > { %862 = vmatpush1.bf16.msra.mxu0 %v720_v52  ;;  %v623_v38 = vmax.f32 %v413_v23, 0.0  ;;  %v744_v41 = vpack.c.bf16 %v611_v20, %v604_v19  ;;  %v618_v42 = vmax.f32 %v408_v26, 0.0  ;;  %v625_v43 = vmax.f32 %v415_v27, 0.0  ;;  %v429_v49 = vld [vmem:[%s3575_s0 + $0x590] sm:$0xff]  ;;  %v426_v55 = vld [vmem:[%s3575_s0 + $0x578] sm:$0xff]  ;;  %2022 = vmatprep.mubr.msk.bf16.mxu0 %vm831_vm0, %v2450_v44  ;;  %v428_v62 = vld [vmem:[%s3575_s0 + $0x588] sm:$0xff] }
  0x30   : > { %945 = vmatpush1.bf16.msra.mxu1 %v722_v53  ;;  %863 = vmatprep.subr.bf16.mxu0 %v728_v54  ;;  %v741_v45 = vpack.c.bf16 %v608_v25, %v601_v24  ;;  %v615_v46 = vmax.f32 %v405_v28, 0.0  ;;  %v622_v47 = vmax.f32 %v412_v32, 0.0  ;;  %v617_v50 = vmax.f32 %v407_v33, 0.0  ;;  %v419_v54 = vld [vmem:[%s3575_s0 + $0x540] sm:$0xff]  ;;  %v421_v58 = vld [vmem:[%s3575_s0 + $0x550] sm:$0xff]  ;;  %v434_v63 = vld [vmem:[%s3575_s0 + $0x5b8] sm:$0xff] }
  0x31   : > { %946 = vmatprep.subr.bf16.mxu1 %v730_v0  ;;  %v624_v51 = vmax.f32 %v414_v34, 0.0  ;;  %v630_v52 = vmax.f32 %v420_v39, 0.0  ;;  %v637_v53 = vmax.f32 %v427_v40, 0.0  ;;  %v743_v56 = vpack.c.bf16 %v610_v36, %v603_v35  ;;  %v441_v0 = vld [vmem:[%s3575_s0 + $0x5f0] sm:$0xff]  ;;  %2027 = vmatprep.mubr.msk.bf16.mxu1 %vm831_vm0, %v2450_v44  ;;  %v443_v4 = vld [vmem:[%s3575_s0 + $0x600] sm:$0xff]  ;;  %v440_v10 = vld [vmem:[%s3575_s0 + $0x5e8] sm:$0xff] }
  0x32   : > { %v749_v57 = vpack.c.bf16 %v623_v38, %v616_v37  ;;  %v751_v59 = vpack.c.bf16 %v625_v43, %v618_v42  ;;  %v632_v60 = vmax.f32 %v422_v48, 0.0  ;;  %v639_v61 = vmax.f32 %v429_v49, 0.0  ;;  %v433_v5 = vld [vmem:[%s3575_s0 + $0x5b0] sm:$0xff]  ;;  %v435_v11 = vld [vmem:[%s3575_s0 + $0x5c0] sm:$0xff]  ;;  %v442_v12 = vld [vmem:[%s3575_s0 + $0x5f8] sm:$0xff] }
  0x33   : > { %864 = vmatpush1.bf16.msra.mxu0 %v727_v3  ;;  %v629_v1 = vmax.f32 %v419_v54, 0.0  ;;  %v636_v2 = vmax.f32 %v426_v55, 0.0  ;;  %v436_v3 = vld [vmem:[%s3575_s0 + $0x5c8] sm:$0xff]  ;;  %v748_v6 = vpack.c.bf16 %v622_v47, %v615_v46  ;;  %v750_v7 = vpack.c.bf16 %v624_v51, %v617_v50  ;;  %v450_v25 = vld [vmem:[%s3575_s0 + $0x638] sm:$0xff]  ;;  %v457_v26 = vld [vmem:[%s3575_s0 + $0x670] sm:$0xff] }
  0x34   : > { %947 = vmatpush1.bf16.msra.mxu1 %v729_v15  ;;  %865 = vmatprep.subr.bf16.mxu0 %v735_v16  ;;  %v756_v8 = vpack.c.bf16 %v637_v53, %v630_v52  ;;  %v631_v13 = vmax.f32 %v421_v58, 0.0  ;;  %v638_v14 = vmax.f32 %v428_v62, 0.0  ;;  %v644_v15 = vmax.f32 %v434_v63, 0.0  ;;  %v448_v17 = vld [vmem:[%s3575_s0 + $0x628] sm:$0xff]  ;;  %v454_v32 = vld [vmem:[%s3575_s0 + $0x658] sm:$0xff]  ;;  %v449_v35 = vld [vmem:[%s3575_s0 + $0x630] sm:$0xff] }
  0x35   : > { %948 = vmatprep.subr.bf16.mxu1 %v737_v18  ;;  %v651_v16 = vmax.f32 %v441_v0, 0.0  ;;  %v455_v18 = vld [vmem:[%s3575_s0 + $0x660] sm:$0xff]  ;;  %v758_v19 = vpack.c.bf16 %v639_v61, %v632_v60  ;;  %v646_v20 = vmax.f32 %v436_v3, 0.0  ;;  %v653_v21 = vmax.f32 %v443_v4, 0.0  ;;  %v456_v39 = vld [vmem:[%s3575_s0 + $0x668] sm:$0xff]  ;;  %v262_v49 = vld [vmem:[%s3575_s0 + $0x58] sm:$0xff] }
  0x36   : > { %v755_v22 = vpack.c.bf16 %v636_v2, %v629_v1  ;;  %v643_v23 = vmax.f32 %v433_v5, 0.0  ;;  %v650_v24 = vmax.f32 %v440_v10, 0.0  ;;  %v645_v27 = vmax.f32 %v435_v11, 0.0  ;;  %v256_v40 = vld [vmem:[%s3575_s0 + $0x28] sm:$0xff]  ;;  %v255_v48 = vld [vmem:[%s3575_s0 + $0x20] sm:$0xff]  ;;  %v257_v54 = vld [vmem:[%s3575_s0 + $0x30] sm:$0xff] }
  0x37   : > { %866 = vmatpush1.bf16.msra.mxu0 %v734_v29  ;;  %v652_v28 = vmax.f32 %v442_v12, 0.0  ;;  %v658_v29 = vmax.f32 %v448_v17, 0.0  ;;  %v757_v33 = vpack.c.bf16 %v638_v14, %v631_v13  ;;  %v763_v34 = vpack.c.bf16 %v651_v16, %v644_v15  ;;  %v264_v55 = vld [vmem:[%s3575_s0 + $0x68] sm:$0xff]  ;;  %v277_v58 = vld [vmem:[%s3575_s0 + $0xd0] sm:$0xff]  ;;  %v291_v10 = vld [vmem:[%s3575_s0 + $0x140] sm:$0xff] }
  0x38   : > { %949 = vmatpush1.bf16.msra.mxu1 %v736_v30  ;;  %867 = vmatprep.subr.bf16.mxu0 %v742_v31  ;;  %v665_v30 = vmax.f32 %v455_v18, 0.0  ;;  %v447_v31 = vld [vmem:[%s3575_s0 + $0x620] sm:$0xff]  ;;  %v765_v36 = vpack.c.bf16 %v653_v21, %v646_v20  ;;  %v660_v37 = vmax.f32 %v450_v25, 0.0  ;;  %v667_v38 = vmax.f32 %v457_v26, 0.0  ;;  %v269_v0 = vld [vmem:[%s3575_s0 + $0x90] sm:$0xff]  ;;  %v276_v1 = vld [vmem:[%s3575_s0 + $0xc8] sm:$0xff] }
  0x39   : > { %950 = vmatprep.subr.bf16.mxu1 %v744_v41  ;;  %v263_v41 = vld [vmem:[%s3575_s0 + $0x60] sm:$0xff]  ;;  %v657_v42 = vmax.f32 %v447_v31, 0.0  ;;  %v664_v43 = vmax.f32 %v454_v32, 0.0  ;;  %v764_v46 = vpack.c.bf16 %v652_v28, %v645_v27  ;;  %v659_v50 = vmax.f32 %v449_v35, 0.0  ;;  %v298_v25 = vld [vmem:[%s3575_s0 + $0x178] sm:$0xff]  ;;  %v305_v26 = vld [vmem:[%s3575_s0 + $0x1b0] sm:$0xff] }
  0x3a   : > { %v770_v47 = vpack.c.bf16 %v665_v30, %v658_v29  ;;  %v666_v51 = vmax.f32 %v456_v39, 0.0  ;;  %v466_v52 = vmax.f32 %v256_v40, 0.0  ;;  %v473_v53 = vmax.f32 %v263_v41, 0.0  ;;  %v2565_v11 = vld [vmem:[%s2432_s12] ss:$8 sps:$4 sm:$0xff]   ;;  %v306_v40 = vld [vmem:[%s3575_s0 + $0x1b8] sm:$0xff] }
  0x3b   : > { %868 = vmatpush1.bf16.msra.mxu0 %v741_v45  ;;  %v762_v45 = vpack.c.bf16 %v650_v24, %v643_v23  ;;  %v465_v60 = vmax.f32 %v255_v48, 0.0  ;;  %v472_v61 = vmax.f32 %v262_v49, 0.0  ;;  %v467_v62 = vmax.f32 %v257_v54, 0.0  ;;  %v283_v17 = vld [vmem:[%s3575_s0 + $0x100] sm:$0xff]  ;;  %v285_v23 = vld [vmem:[%s3575_s0 + $0x110] sm:$0xff]  ;;  %v292_v24 = vld [vmem:[%s3575_s0 + $0x148] sm:$0xff] }
  0x3c   : > { %951 = vmatpush1.bf16.msra.mxu1 %v743_v56  ;;  %869 = vmatprep.subr.bf16.mxu0 %v749_v57  ;;  %v772_v56 = vpack.c.bf16 %v667_v38, %v660_v37  ;;  %v270_v57 = vld [vmem:[%s3575_s0 + $0x98] sm:$0xff]  ;;  %v474_v63 = vmax.f32 %v264_v55, 0.0  ;;  %v771_v2 = vpack.c.bf16 %v666_v51, %v659_v50  ;;  %v676_v3 = vpack.c.bf16 %v473_v53, %v466_v52  ;;  %v299_v39 = vld [vmem:[%s3575_s0 + $0x180] sm:$0xff]  ;;  %v312_v41 = vld [vmem:[%s3575_s0 + $0x1e8] sm:$0xff] }
  0x3d   : > { %952 = vmatprep.subr.bf16.mxu1 %v751_v59  ;;  %v769_v59 = vpack.c.bf16 %v664_v43, %v657_v42  ;;  %v480_v4 = vmax.f32 %v270_v57, 0.0  ;;  %v487_v5 = vmax.f32 %v277_v58, 0.0  ;;  %v479_v12 = vmax.f32 %v269_v0, 0.0  ;;  %v2587_v27 = vld [vmem:[%s2432_s12 + $0x14] ss:$8 sps:$4 sm:$0xff]   ;;  %v319_v42 = vld [vmem:[%s3575_s0 + $0x220] sm:$0xff] }
  0x3e   : > { %v486_v13 = vmax.f32 %v276_v1, 0.0  ;;  %v675_v14 = vpack.c.bf16 %v472_v61, %v465_v60  ;;  %v677_v15 = vpack.c.bf16 %v474_v63, %v467_v62  ;;  %v501_v21 = vmax.f32 %v291_v10, 0.0  ;;  %v311_v50 = vld [vmem:[%s3575_s0 + $0x1e0] sm:$0xff]  ;;  %v318_v51 = vld [vmem:[%s3575_s0 + $0x218] sm:$0xff]  ;;  %v320_v57 = vld [vmem:[%s3575_s0 + $0x228] sm:$0xff] }
  0x3f   : > { %870 = vmatpush1.bf16.msra.mxu0 %v748_v6  ;;  %v271_v6 = vld [vmem:[%s3575_s0 + $0xa0] sm:$0xff]  ;;  %v683_v18 = vpack.c.bf16 %v487_v5, %v480_v4  ;;  %v493_v29 = vmax.f32 %v283_v17, 0.0  ;;  %v495_v31 = vmax.f32 %v285_v23, 0.0  ;;  %v502_v32 = vmax.f32 %v292_v24, 0.0  ;;  %v326_v58 = vld [vmem:[%s3575_s0 + $0x258] sm:$0xff] }
  0x40   : > { %953 = vmatpush1.bf16.msra.mxu1 %v750_v7  ;;  %871 = vmatprep.subr.bf16.mxu0 %v756_v8  ;;  %v278_v7 = vld [vmem:[%s3575_s0 + $0xd8] sm:$0xff]  ;;  %v284_v8 = vld [vmem:[%s3575_s0 + $0x108] sm:$0xff]  ;;  %v481_v16 = vmax.f32 %v271_v6, 0.0  ;;  %v682_v28 = vpack.c.bf16 %v486_v13, %v479_v12  ;;  %v508_v37 = vmax.f32 %v298_v25, 0.0  ;;  %v515_v38 = vmax.f32 %v305_v26, 0.0  ;;  %v347_v13 = vld [vmem:[%s3575_s0 + $0x300] sm:$0xff] }
  0x41   : > { %954 = vmatprep.subr.bf16.mxu1 %v758_v19  ;;  %v488_v19 = vmax.f32 %v278_v7, 0.0  ;;  %v494_v20 = vmax.f32 %v284_v8, 0.0  ;;  %v691_v48 = vpack.c.bf16 %v502_v32, %v495_v31  ;;  %v509_v49 = vmax.f32 %v299_v39, 0.0  ;;  %v2637_v60 = vld [vmem:[%s2432_s12 + $0x24] ss:$8 sps:$4 sm:$0xff]   ;;  %v334_v10 = vld [vmem:[%s3575_s0 + $0x298] sm:$0xff] }
  0x42   : > { %v697_v52 = vpack.c.bf16 %v515_v38, %v508_v37  ;;  %v516_v53 = vmax.f32 %v306_v40, 0.0  ;;  %v522_v54 = vmax.f32 %v312_v41, 0.0  ;;  %v529_v55 = vmax.f32 %v319_v42, 0.0  ;;  %v327_v8 = vld [vmem:[%s3575_s0 + $0x260] sm:$0xff]  ;;  %v340_v12 = vld [vmem:[%s3575_s0 + $0x2c8] sm:$0xff]  ;;  %v346_v25 = vld [vmem:[%s3575_s0 + $0x2f8] sm:$0xff] }
  0x43   : > { %872 = vmatpush1.bf16.msra.mxu0 %v755_v22  ;;  %v290_v22 = vld [vmem:[%s3575_s0 + $0x138] sm:$0xff]  ;;  %v684_v35 = vpack.c.bf16 %v488_v19, %v481_v16  ;;  %v521_v62 = vmax.f32 %v311_v50, 0.0  ;;  %v528_v63 = vmax.f32 %v318_v51, 0.0  ;;  %v530_v1 = vmax.f32 %v320_v57, 0.0  ;;  %v2663_v16 = vld [vmem:[%s2432_s12 + $0x20] ss:$8 sps:$4 sm:$0xff]  }
  0x44   : > { %955 = vmatpush1.bf16.msra.mxu1 %v757_v33  ;;  %873 = vmatprep.subr.bf16.mxu0 %v763_v34  ;;  %v500_v30 = vmax.f32 %v290_v22, 0.0  ;;  %v297_v33 = vld [vmem:[%s3575_s0 + $0x170] sm:$0xff]  ;;  %v304_v34 = vld [vmem:[%s3575_s0 + $0x1a8] sm:$0xff]  ;;  %v698_v4 = vpack.c.bf16 %v516_v53, %v509_v49  ;;  %v704_v5 = vpack.c.bf16 %v529_v55, %v522_v54  ;;  %v536_v6 = vmax.f32 %v326_v58, 0.0  ;;  %v367_v55 = vld [vmem:[%s3575_s0 + $0x3a0] sm:$0xff] }
  0x45   : > { %956 = vmatprep.subr.bf16.mxu1 %v765_v36  ;;  %v690_v36 = vpack.c.bf16 %v501_v21, %v494_v20  ;;  %v507_v43 = vmax.f32 %v297_v33, 0.0  ;;  %v703_v17 = vpack.c.bf16 %v528_v63, %v521_v62  ;;  %v537_v19 = vmax.f32 %v327_v8, 0.0  ;;  %v339_v20 = vld [vmem:[%s3575_s0 + $0x2c0] sm:$0xff]  ;;  %v341_v26 = vld [vmem:[%s3575_s0 + $0x2d0] sm:$0xff]  ;;  %v360_v38 = vld [vmem:[%s3575_s0 + $0x368] sm:$0xff] }
  0x46   : > { %v544_v22 = vmax.f32 %v334_v10, 0.0  ;;  %v550_v23 = vmax.f32 %v340_v12, 0.0  ;;  %v557_v24 = vmax.f32 %v347_v13, 0.0  ;;  %v2687_v31 = vld [vmem:[%s2432_s12 + $0x34] ss:$8 sps:$4 sm:$0xff]   ;;  %v549_v33 = vmax.f32 %v339_v20, 0.0 }
  0x47   : > { %874 = vmatpush1.bf16.msra.mxu0 %v762_v45  ;;  %v514_v45 = vmax.f32 %v304_v34, 0.0  ;;  %v556_v34 = vmax.f32 %v346_v25, 0.0  ;;  %v353_v37 = vld [vmem:[%s3575_s0 + $0x330] sm:$0xff]  ;;  %v570_v50 = vmax.f32 %v360_v38, 0.0  ;;  %v376_v63 = vld [vmem:[%s3575_s0 + $0x3e8] sm:$0xff]  ;;  %v403_v20 = vld [vmem:[%s3575_s0 + $0x4c0] sm:$0xff] }
  0x48   : > { %957 = vmatpush1.bf16.msra.mxu1 %v764_v46  ;;  %875 = vmatprep.subr.bf16.mxu0 %v770_v47  ;;  %v2613_v46 = vld [vmem:[%s2432_s12 + $0x10] ss:$8 sps:$4 sm:$0xff]   ;;  %v689_v47 = vpack.c.bf16 %v500_v30, %v493_v29  ;;  %v712_v39 = vpack.c.bf16 %v544_v22, %v537_v19  ;;  %v718_v40 = vpack.c.bf16 %v557_v24, %v550_v23  ;;  %v563_v49 = vmax.f32 %v353_v37, 0.0  ;;  %v396_v19 = vld [vmem:[%s3575_s0 + $0x488] sm:$0xff] }
  0x49   : > { %958 = vmatprep.subr.bf16.mxu1 %v772_v56  ;;  %v313_v56 = vld [vmem:[%s3575_s0 + $0x1f0] sm:$0xff]  ;;  %v696_v61 = vpack.c.bf16 %v514_v45, %v507_v43  ;;  %v354_v29 = vld [vmem:[%s3575_s0 + $0x338] sm:$0xff]  ;;  %v355_v43 = vld [vmem:[%s3575_s0 + $0x340] sm:$0xff]  ;;  %vm1174_vm1 = vcmask 130048  }
  0x4a   : > { %v523_v0 = vmax.f32 %v313_v56, 0.0  ;;  %v361_v30 = vld [vmem:[%s3575_s0 + $0x370] sm:$0xff]  ;;  %v564_v41 = vmax.f32 %v354_v29, 0.0  ;;  %v362_v45 = vld [vmem:[%s3575_s0 + $0x378] sm:$0xff]  ;;  %v565_v54 = vmax.f32 %v355_v43, 0.0 }
  0x4b   : > { %876 = vmatpush1.bf16.msra.mxu0 %v769_v59  ;;  %v333_v59 = vld [vmem:[%s3575_s0 + $0x290] sm:$0xff]  ;;  %v571_v42 = vmax.f32 %v361_v30, 0.0  ;;  %v572_v57 = vmax.f32 %v362_v45, 0.0  ;;  %v2763_v22 = vld [vmem:[%s2432_s12 + $0x40] ss:$8 sps:$4 sm:$0xff]   ;;  %v402_v29 = vld [vmem:[%s3575_s0 + $0x4b8] sm:$0xff] }
  0x4c   : > { %959 = vmatpush1.bf16.msra.mxu1 %v771_v2  ;;  %1013 = vmatprep.subr.bf16.mxu0 %v676_v3  ;;  %v325_v2 = vld [vmem:[%s3575_s0 + $0x250] sm:$0xff]  ;;  %v332_v3 = vld [vmem:[%s3575_s0 + $0x288] sm:$0xff]  ;;  %v543_v7 = vmax.f32 %v333_v59, 0.0  ;;  %v410_v37 = vld [vmem:[%s3575_s0 + $0x4f8] sm:$0xff] }
  0x4d   : > { %1096 = vmatprep.subr.bf16.mxu1 %v2100_v9  ;;  %v2713_v51 = vld [vmem:[%s2432_s12 + $0x30] ss:$8 sps:$4 sm:$0xff]   ;;  %v725_v56 = vpack.c.bf16 %v571_v42, %v564_v41  ;;  %v726_v10 = vpack.c.bf16 %v572_v57, %v565_v54 }
  0x4e   : > { %880 = vmatmul.mubr.bf16.vlgmr.msra.gmra.mrb[0].mxu0 %v2565_v11  ;;  %v711_v21 = vpack.c.bf16 %v543_v7, %v536_v6  ;;  %v369_v62 = vld [vmem:[%s3575_s0 + $0x3b0] sm:$0xff]  ;;  %v586_v7 = vmax.f32 %v376_v63, 0.0  ;;  %v418_v54 = vld [vmem:[%s3575_s0 + $0x538] sm:$0xff]  ;;  %v423_v63 = vld [vmem:[%s3575_s0 + $0x560] sm:$0xff] }
  0x4f   : > { %963 = vmatmul.mubr.bf16.vlgmr.msra.gmra.mrb[0].mxu1 %v2565_v11  ;;  %1014 = vmatpush1.bf16.msra.mxu0 %v675_v14  ;;  %v535_v14 = vmax.f32 %v325_v2, 0.0  ;;  %v2737_v2 = vld [vmem:[%s2432_s12 + $0x44] ss:$8 sps:$4 sm:$0xff]   ;;  %v579_v6 = vmax.f32 %v369_v62, 0.0  ;;  %v381_v8 = vld [vmem:[%s3575_s0 + $0x410] sm:$0xff] }
  0x50   : > { %1097 = vmatpush1.bf16.msra.mxu1 %v677_v15  ;;  %1015 = vmatprep.subr.bf16.mxu0 %v683_v18  ;;  %v542_v15 = vmax.f32 %v332_v3, 0.0  ;;  %v705_v18 = vpack.c.bf16 %v530_v1, %v523_v0  ;;  %v382_v0 = vld [vmem:[%s3575_s0 + $0x418] sm:$0xff]  ;;  %v389_v1 = vld [vmem:[%s3575_s0 + $0x450] sm:$0xff]  ;;  %v724_v3 = vpack.c.bf16 %v570_v50, %v563_v49 }
  0x51   : > { %1098 = vmatprep.subr.bf16.mxu1 %v2100_v9  ;;  %2023 = vmatprep.mubr.msk.bf16.mxu0 %vm831_vm0, %v2587_v27  ;;  %v592_v13 = vmax.f32 %v382_v0, 0.0  ;;  %v733_v24 = vpack.c.bf16 %v586_v7, %v579_v6  ;;  %v417_v38 = vld [vmem:[%s3575_s0 + $0x530] sm:$0xff]  ;;  %v430_v0 = vld [vmem:[%s3575_s0 + $0x598] sm:$0xff]  ;;  %v432_v6 = vld [vmem:[%s3575_s0 + $0x5a8] sm:$0xff] }
  0x52   : > { %2028 = vmatprep.mubr.msk.bf16.mxu1 %vm831_vm0, %v2587_v27  ;;  %v710_v32 = vpack.c.bf16 %v542_v15, %v535_v14  ;;  %v599_v14 = vmax.f32 %v389_v1, 0.0  ;;  %v388_v15 = vld [vmem:[%s3575_s0 + $0x448] sm:$0xff]  ;;  %v627_v49 = vmax.f32 %v417_v38, 0.0  ;;  %v409_v50 = vld [vmem:[%s3575_s0 + $0x4f0] sm:$0xff]  ;;  %v438_v7 = vld [vmem:[%s3575_s0 + $0x5d8] sm:$0xff] }
  0x53   : > { %1016 = vmatpush1.bf16.msra.mxu0 %v682_v28  ;;  %v348_v28 = vld [vmem:[%s3575_s0 + $0x308] sm:$0xff]  ;;  %v598_v25 = vmax.f32 %v388_v15, 0.0  ;;  %v642_v15 = vmax.f32 %v432_v6, 0.0 }
  0x54   : > { %1099 = vmatpush1.bf16.msra.mxu1 %v684_v35  ;;  %1017 = vmatprep.subr.bf16.mxu0 %v690_v36  ;;  %v551_v35 = vmax.f32 %v341_v26, 0.0  ;;  %v558_v36 = vmax.f32 %v348_v28, 0.0  ;;  %v395_v28 = vld [vmem:[%s3575_s0 + $0x480] sm:$0xff]  ;;  %v739_v30 = vpack.c.bf16 %v599_v14, %v592_v13 }
  0x55   : > { %1100 = vmatprep.subr.bf16.mxu1 %v2100_v9 }
  0x56   : > { %890 = vmatmul.mubr.bf16.gmra.mrb[4].mxu0 %v2613_v46  ;;  %v719_v53 = vpack.c.bf16 %v558_v36, %v551_v35  ;;  %v397_v35 = vld [vmem:[%s3575_s0 + $0x490] sm:$0xff]  ;;  %v404_v36 = vld [vmem:[%s3575_s0 + $0x4c8] sm:$0xff] }
  0x57   : > { %1018 = vmatpush1.bf16.msra.mxu0 %v689_v47  ;;  %973 = vmatmul.mubr.bf16.gmra.mrb[4].mxu1 %v2613_v46  ;;  %v368_v47 = vld [vmem:[%s3575_s0 + $0x3a8] sm:$0xff]  ;;  %v607_v42 = vmax.f32 %v397_v35, 0.0  ;;  %v614_v43 = vmax.f32 %v404_v36, 0.0 }
  0x58   : > { %1101 = vmatpush1.bf16.msra.mxu1 %v691_v48  ;;  %1019 = vmatprep.subr.bf16.mxu0 %v697_v52  ;;  %v375_v48 = vld [vmem:[%s3575_s0 + $0x3e0] sm:$0xff]  ;;  %v717_v52 = vpack.c.bf16 %v556_v34, %v549_v33  ;;  %v578_v58 = vmax.f32 %v368_v47, 0.0  ;;  %v606_v33 = vmax.f32 %v396_v19, 0.0  ;;  %v613_v34 = vmax.f32 %v403_v20, 0.0 }
  0x59   : > { %1102 = vmatprep.subr.bf16.mxu1 %v2100_v9  ;;  %2024 = vmatprep.mubr.msk.bf16.mxu0 %vm831_vm0, %v2637_v60  ;;  %v585_v59 = vmax.f32 %v375_v48, 0.0  ;;  %v620_v48 = vmax.f32 %v410_v37, 0.0  ;;  %v648_v19 = vmax.f32 %v438_v7, 0.0 }
  0x5a   : > { %2029 = vmatprep.mubr.msk.bf16.mxu1 %vm831_vm0, %v2637_v60  ;;  %v746_v47 = vpack.c.bf16 %v613_v34, %v606_v33 }
  0x5b   : > { %1020 = vmatpush1.bf16.msra.mxu0 %v696_v61  ;;  %v374_v61 = vld [vmem:[%s3575_s0 + $0x3d8] sm:$0xff]  ;;  %v732_v12 = vpack.c.bf16 %v585_v59, %v578_v58  ;;  %v747_v58 = vpack.c.bf16 %v614_v43, %v607_v42  ;;  %v619_v59 = vmax.f32 %v409_v50, 0.0  ;;  %v753_v1 = vpack.c.bf16 %v627_v49, %v620_v48  ;;  %v460_v42 = vld [vmem:[%s3575_s0 + $0x688] sm:$0xff] }
  0x5c   : > { %1103 = vmatpush1.bf16.msra.mxu1 %v698_v4  ;;  %1021 = vmatprep.subr.bf16.mxu0 %v704_v5  ;;  %v577_v4 = vmax.f32 %v367_v55, 0.0  ;;  %v584_v5 = vmax.f32 %v374_v61, 0.0  ;;  %v424_v55 = vld [vmem:[%s3575_s0 + $0x568] sm:$0xff] }
  0x5d   : > { %1104 = vmatprep.subr.bf16.mxu1 %v2100_v9 }
  0x5e   : > { %900 = vmatmul.mubr.bf16.gmra.mrb[8].mxu0 %v2663_v16  ;;  %v731_v23 = vpack.c.bf16 %v584_v5, %v577_v4  ;;  %v634_v4 = vmax.f32 %v424_v55, 0.0 }
  0x5f   : > { %1022 = vmatpush1.bf16.msra.mxu0 %v703_v17  ;;  %983 = vmatmul.mubr.bf16.gmra.mrb[8].mxu1 %v2663_v16  ;;  %v383_v17 = vld [vmem:[%s3575_s0 + $0x420] sm:$0xff] }
  0x60   : > { %1105 = vmatpush1.bf16.msra.mxu1 %v705_v18  ;;  %1023 = vmatprep.subr.bf16.mxu0 %v711_v21  ;;  %v390_v18 = vld [vmem:[%s3575_s0 + $0x458] sm:$0xff]  ;;  %v591_v21 = vmax.f32 %v381_v8, 0.0  ;;  %v593_v26 = vmax.f32 %v383_v17, 0.0  ;;  %v445_v8 = vld [vmem:[%s3575_s0 + $0x610] sm:$0xff] }
  0x61   : > { %1106 = vmatprep.subr.bf16.mxu1 %v2100_v9  ;;  %2025 = vmatprep.mubr.msk.bf16.mxu0 %vm831_vm0, %v2687_v31  ;;  %v655_v20 = vmax.f32 %v445_v8, 0.0 }
  0x62   : > { %2030 = vmatprep.mubr.msk.bf16.mxu1 %vm831_vm0, %v2687_v31  ;;  %v738_v41 = vpack.c.bf16 %v598_v25, %v591_v21  ;;  %v437_v21 = vld [vmem:[%s3575_s0 + $0x5d0] sm:$0xff]  ;;  %v446_v25 = vld [vmem:[%s3575_s0 + $0x618] sm:$0xff] }
  0x63   : > { %1024 = vmatpush1.bf16.msra.mxu0 %v710_v32  ;;  %v600_v32 = vmax.f32 %v390_v18, 0.0  ;;  %v767_v35 = vpack.c.bf16 %v655_v20, %v648_v19  ;;  %v656_v36 = vmax.f32 %v446_v25, 0.0 }
  0x64   : > { %1107 = vmatpush1.bf16.msra.mxu1 %v712_v39  ;;  %1025 = vmatprep.subr.bf16.mxu0 %v718_v40  ;;  %v605_v39 = vmax.f32 %v395_v28, 0.0  ;;  %v612_v40 = vmax.f32 %v402_v29, 0.0  ;;  %v459_v28 = vld [vmem:[%s3575_s0 + $0x680] sm:$0xff] }
  0x65   : > { %1108 = vmatprep.subr.bf16.mxu1 %v2100_v9  ;;  %v740_v45 = vpack.c.bf16 %v600_v32, %v593_v26  ;;  %v452_v26 = vld [vmem:[%s3575_s0 + $0x648] sm:$0xff]  ;;  %v647_v32 = vmax.f32 %v437_v21, 0.0  ;;  %v669_v38 = vmax.f32 %v459_v28, 0.0 }
  0x66   : > { %910 = vmatmul.mubr.bf16.gmra.mrb[12].mxu0 %v2713_v51  ;;  %v745_v57 = vpack.c.bf16 %v612_v40, %v605_v39  ;;  %v662_v37 = vmax.f32 %v452_v26, 0.0  ;;  %v451_v39 = vld [vmem:[%s3575_s0 + $0x640] sm:$0xff]  ;;  %v458_v40 = vld [vmem:[%s3575_s0 + $0x678] sm:$0xff] }
  0x67   : > { %1026 = vmatpush1.bf16.msra.mxu0 %v717_v52  ;;  %993 = vmatmul.mubr.bf16.gmra.mrb[12].mxu1 %v2713_v51  ;;  %v416_v52 = vld [vmem:[%s3575_s0 + $0x528] sm:$0xff] }
  0x68   : > { %1109 = vmatpush1.bf16.msra.mxu1 %v719_v53  ;;  %1027 = vmatprep.subr.bf16.mxu0 %v725_v56  ;;  %v411_v53 = vld [vmem:[%s3575_s0 + $0x500] sm:$0xff]  ;;  %v626_v61 = vmax.f32 %v416_v52, 0.0  ;;  %v774_v49 = vpack.c.bf16 %v669_v38, %v662_v37  ;;  %v670_v52 = vmax.f32 %v460_v42, 0.0 }
  0x69   : > { %1110 = vmatprep.subr.bf16.mxu1 %v2100_v9  ;;  %2026 = vmatprep.mubr.msk.bf16.mxu0 %vm831_vm0, %v2737_v2  ;;  %v431_v56 = vld [vmem:[%s3575_s0 + $0x5a0] sm:$0xff]  ;;  %v621_v62 = vmax.f32 %v411_v53, 0.0 }
  0x6a   : > { %2031 = vmatprep.mubr.msk.bf16.mxu1 %vm831_vm0, %v2737_v2  ;;  %v641_v5 = vmax.f32 %v431_v56, 0.0  ;;  %v752_v13 = vpack.c.bf16 %v626_v61, %v619_v59 }
  0x6b   : > { %1028 = vmatpush1.bf16.msra.mxu0 %v724_v3  ;;  %v628_v3 = vmax.f32 %v418_v54, 0.0 }
  0x6c   : > { %1111 = vmatpush1.bf16.msra.mxu1 %v726_v10  ;;  %1029 = vmatprep.subr.bf16.mxu0 %v732_v12  ;;  %v633_v10 = vmax.f32 %v423_v63, 0.0  ;;  %v640_v12 = vmax.f32 %v430_v0, 0.0  ;;  %v760_v18 = vpack.c.bf16 %v641_v5, %v634_v4 }
  0x6d   : > { %1112 = vmatprep.subr.bf16.mxu1 %v2100_v9  ;;  %v754_v17 = vpack.c.bf16 %v628_v3, %v621_v62 }
  0x6e   : > { %920 = vmatmul.mubr.bf16.gmra.mrb[16].mxu0 %v2763_v22  ;;  %v759_v29 = vpack.c.bf16 %v640_v12, %v633_v10 }
  0x6f   : > { %1030 = vmatpush1.bf16.msra.mxu0 %v731_v23  ;;  %1003 = vmatmul.mubr.bf16.gmra.mrb[16].mxu1 %v2763_v22  ;;  %v444_v23 = vld [vmem:[%s3575_s0 + $0x608] sm:$0xff] }
  0x70   : > { %1113 = vmatpush1.bf16.msra.mxu1 %v733_v24  ;;  %1031 = vmatprep.subr.bf16.mxu0 %v739_v30  ;;  %v439_v24 = vld [vmem:[%s3575_s0 + $0x5e0] sm:$0xff]  ;;  %v654_v33 = vmax.f32 %v444_v23, 0.0 }
  0x71   : > { %1114 = vmatprep.subr.bf16.mxu1 %v2100_v9  ;;  %2032 = vmatprep.mubr.msk.bf16.mxu0 %vm831_vm0, %v2450_v44  ;;  %v649_v34 = vmax.f32 %v439_v24, 0.0 }
  0x72   : > { %2037 = vmatprep.mubr.msk.bf16.mxu1 %vm831_vm0, %v2450_v44  ;;  %v425_v44 = vld [vmem:[%s3575_s0 + $0x570] sm:$0xff]  ;;  %v766_v43 = vpack.c.bf16 %v654_v33, %v647_v32 }
  0x73   : > { %1032 = vmatpush1.bf16.msra.mxu0 %v738_v41  ;;  %v635_v14 = vmax.f32 %v425_v44, 0.0  ;;  %v453_v41 = vld [vmem:[%s3575_s0 + $0x650] sm:$0xff]  ;;  %v768_v48 = vpack.c.bf16 %v656_v36, %v649_v34 }
  0x74   : > { %1115 = vmatpush1.bf16.msra.mxu1 %v740_v45  ;;  %1033 = vmatprep.subr.bf16.mxu0 %v746_v47  ;;  %v661_v45 = vmax.f32 %v451_v39, 0.0  ;;  %v668_v47 = vmax.f32 %v458_v40, 0.0  ;;  %v663_v50 = vmax.f32 %v453_v41, 0.0 }
  0x75   : > { %1116 = vmatprep.subr.bf16.mxu1 %v2100_v9  ;;  %v761_v30 = vpack.c.bf16 %v642_v15, %v635_v14 }
  0x76   : > { %v773_v53 = vpack.c.bf16 %v668_v47, %v661_v45  ;;  %v775_v54 = vpack.c.bf16 %v670_v52, %v663_v50 }
  0x77   : > { %1034 = vmatpush1.bf16.msra.mxu0 %v745_v57 }
  0x78   : > { %1117 = vmatpush1.bf16.msra.mxu1 %v747_v58  ;;  %1035 = vmatprep.subr.bf16.mxu0 %v753_v1 }
  0x79   : > { %1118 = vmatprep.subr.bf16.mxu1 %v2100_v9 }
  0x7b   : > { %1036 = vmatpush1.bf16.msra.mxu0 %v752_v13 }
  0x7c   : > { %1119 = vmatpush1.bf16.msra.mxu1 %v754_v17  ;;  %1037 = vmatprep.subr.bf16.mxu0 %v760_v18 }
  0x7d   : > { %1120 = vmatprep.subr.bf16.mxu1 %v2100_v9 }
  0x7f   : > { %1038 = vmatpush1.bf16.msra.mxu0 %v759_v29 }
  0x80   : > { %1121 = vmatpush1.bf16.msra.mxu1 %v761_v30  ;;  %1039 = vmatprep.subr.bf16.mxu0 %v767_v35 }
  0x81   : > { %1122 = vmatprep.subr.bf16.mxu1 %v2100_v9 }
  0x83   : > { %1040 = vmatpush1.bf16.msra.mxu0 %v766_v43 }
  0x84   : > { %1123 = vmatpush1.bf16.msra.mxu1 %v768_v48  ;;  %1041 = vmatprep.subr.bf16.mxu0 %v774_v49 }
  0x85   : > { %1124 = vmatprep.subr.bf16.mxu1 %v2100_v9 }
  0x87   : > { %1042 = vmatpush1.bf16.msra.mxu0 %v773_v53 }
  0x88   : > { %1125 = vmatpush1.bf16.msra.mxu1 %v775_v54 }
  0x8a   : > { %1046 = vmatmul.mubr.bf16.vlgmr.msra.gmra.mrb[20].mxu0 %v2565_v11 }
  0x8b   : > { %1129 = vmatmul.mubr.bf16.vlgmr.msra.gmra.mrb[20].mxu1 %v2565_v11  ;;  %2033 = vmatprep.mubr.msk.bf16.mxu0 %vm831_vm0, %v2587_v27 }
  0x8c   : > { %2038 = vmatprep.mubr.msk.bf16.mxu1 %vm831_vm0, %v2587_v27 }
  0x92   : > { %1056 = vmatmul.mubr.bf16.gmra.mrb[24].mxu0 %v2613_v46 }
  0x93   : > { %1137 = vmatmul.mubr.bf16.gmra.mrb[24].mxu1 %v2613_v46  ;;  %2034 = vmatprep.mubr.msk.bf16.mxu0 %vm831_vm0, %v2637_v60 }
  0x94   : > { %2039 = vmatprep.mubr.msk.bf16.mxu1 %vm831_vm0, %v2637_v60 }
  0x9a   : > { %1066 = vmatmul.mubr.bf16.gmra.mrb[28].mxu0 %v2663_v16 }
  0x9b   : > { %1145 = vmatmul.mubr.bf16.gmra.mrb[28].mxu1 %v2663_v16  ;;  %2035 = vmatprep.mubr.msk.bf16.mxu0 %vm831_vm0, %v2687_v31 }
  0x9c   : > { %2040 = vmatprep.mubr.msk.bf16.mxu1 %vm831_vm0, %v2687_v31 }
  0xa2   : > { %1076 = vmatmul.mubr.bf16.gmra.mrb[32].mxu0 %v2713_v51 }
  0xa3   : > { %1153 = vmatmul.mubr.bf16.gmra.mrb[32].mxu1 %v2713_v51  ;;  %2036 = vmatprep.mubr.msk.bf16.mxu0 %vm831_vm0, %v2737_v2 }
  0xa4   : > { %2041 = vmatprep.mubr.msk.bf16.mxu1 %vm831_vm0, %v2737_v2 }
  0xaa   : > { %1086 = vmatmul.mubr.bf16.gmra.mrb[36].mxu0 %v2763_v22 }
  0xab   : > { %1161 = vmatmul.mubr.bf16.gmra.mrb[36].mxu1 %v2763_v22 }
 0x121   : > { %v2890_v9 = vpop.f32.mrb[0].mxu0 }
 0x122   : > { %v1260_v11 = vmul.f32 %v2890_v9, %v2890_v9  ;;  %v2894_v27 = vpop.f32.mrb[1].mxu0  ;;  %v2896_v46 = vpop.f32.mrb[0].mxu1 }
 0x123   : > { %v1169_v60 = vadd.f32 %v2894_v27, %v2890_v9  ;;  %v1261_v16 = vmul.f32 %v2894_v27, %v2894_v27  ;;  %v1262_v31 = vmul.f32 %v2896_v46, %v2896_v46  ;;  %v2904_v51 = vpop.f32.mrb[2].mxu0  ;;  %v2906_v2 = vpop.f32.mrb[1].mxu1 }
 0x124   : > { %v1267_v22 = vmul.f32 %v2904_v51, %v2904_v51  ;;  %v1263_v55 = vmul.f32 %v2906_v2, %v2906_v2  ;;  %v2912_v56 = vpop.f32.mrb[3].mxu0  ;;  %v2914_v57 = vpop.f32.mrb[2].mxu1 }
 0x125   : > { %v1330_v58 = vadd.f32 %v1261_v16, %v1260_v11  ;;  %v1170_v59 = vadd.f32 %v1169_v60, %v2896_v46  ;;  %v1179_v61 = vadd.f32 %v2912_v56, %v2904_v51  ;;  %v1268_v62 = vmul.f32 %v2912_v56, %v2912_v56  ;;  %v2921_v63 = vpop.f32.mrb[3].mxu1 }
 0x126   : > { %v1269_v0 = vmul.f32 %v2914_v57, %v2914_v57  ;;  %v1270_v8 = vmul.f32 %v2921_v63, %v2921_v63 }
 0x127   : > { %v1331_v1 = vadd.f32 %v1330_v58, %v1262_v31  ;;  %v2926_v3 = vadd.f32 %v1170_v59, %v2906_v2  ;;  %v1339_v4 = vadd.f32 %v1268_v62, %v1267_v22  ;;  %v1180_v5 = vadd.f32 %v1179_v61, %v2914_v57 }
 0x129   : > { %v2929_v44 = vadd.f32 %v1331_v1, %v1263_v55  ;;  %v1340_v6 = vadd.f32 %v1339_v4, %v1269_v0  ;;  %v2932_v7 = vadd.f32 %v1180_v5, %v2921_v63  ;;  %v2936_v10 = vpop.f32.mrb[4].mxu0 }
 0x12a   : > { %v1274_v12 = vmul.f32 %v2936_v10, %v2936_v10  ;;  %v2940_v13 = vpop.f32.mrb[5].mxu0  ;;  %v2942_v14 = vpop.f32.mrb[4].mxu1 }
 0x12b   : > { %v2944_v15 = vadd.f32 %v1340_v6, %v1270_v8  ;;  %v1188_v17 = vadd.f32 %v2940_v13, %v2936_v10  ;;  %v1275_v18 = vmul.f32 %v2940_v13, %v2940_v13  ;;  %v2950_v19 = vpop.f32.mrb[6].mxu0  ;;  %v1276_v20 = vmul.f32 %v2942_v14, %v2942_v14  ;;  %v2954_v21 = vpop.f32.mrb[5].mxu1 }
 0x12c   : > { %v1281_v23 = vmul.f32 %v2950_v19, %v2950_v19  ;;  %v2958_v24 = vpop.f32.mrb[7].mxu0  ;;  %v1277_v25 = vmul.f32 %v2954_v21, %v2954_v21  ;;  %v2962_v26 = vpop.f32.mrb[6].mxu1 }
 0x12d   : > { %v1348_v28 = vadd.f32 %v1275_v18, %v1274_v12  ;;  %v1197_v29 = vadd.f32 %v2958_v24, %v2950_v19  ;;  %v1282_v30 = vmul.f32 %v2958_v24, %v2958_v24  ;;  %v1189_v32 = vadd.f32 %v1188_v17, %v2942_v14  ;;  %v2969_v33 = vpop.f32.mrb[7].mxu1 }
 0x12e   : > { %v1283_v34 = vmul.f32 %v2962_v26, %v2962_v26  ;;  %v1284_v35 = vmul.f32 %v2969_v33, %v2969_v33 }
 0x12f   : > { %v1357_v36 = vadd.f32 %v1282_v30, %v1281_v23  ;;  %v1349_v37 = vadd.f32 %v1348_v28, %v1276_v20  ;;  %v2976_v38 = vadd.f32 %v1189_v32, %v2954_v21  ;;  %v1198_v39 = vadd.f32 %v1197_v29, %v2962_v26 }
 0x131   : > { %v2979_v40 = vadd.f32 %v1349_v37, %v1277_v25  ;;  %v1358_v41 = vadd.f32 %v1357_v36, %v1283_v34  ;;  %v2982_v42 = vadd.f32 %v1198_v39, %v2969_v33  ;;  %v2984_v43 = vpop.f32.mrb[8].mxu0 }
 0x132   : > { %v1288_v45 = vmul.f32 %v2984_v43, %v2984_v43  ;;  %v2988_v47 = vpop.f32.mrb[9].mxu0  ;;  %v2990_v48 = vpop.f32.mrb[8].mxu1 }
 0x133   : > { %3616 = vst [vmem:[#allocation2_spill] sm:$0xff] %v2988_v47  ;;  %3617 = vst [vmem:[#allocation3_spill] sm:$0xff] %v2990_v48  ;;  %v2992_v49 = vadd.f32 %v1358_v41, %v1284_v35  ;;  %v1206_v50 = vadd.f32 %v2988_v47, %v2984_v43  ;;  %v1289_v52 = vmul.f32 %v2988_v47, %v2988_v47  ;;  %v2998_v53 = vpop.f32.mrb[10].mxu0  ;;  %v3002_v11 = vpop.f32.mrb[9].mxu1 }
 0x134   : > { %3618 = vst [vmem:[#allocation4_spill] sm:$0xff] %v2998_v53  ;;  %v1290_v54 = vmul.f32 %v2990_v48, %v2990_v48  ;;  %3619 = vst [vmem:[#allocation5_spill] sm:$0xff] %v3002_v11  ;;  %v1295_v60 = vmul.f32 %v2998_v53, %v2998_v53  ;;  %v3006_v16 = vpop.f32.mrb[11].mxu0  ;;  %v1291_v31 = vmul.f32 %v3002_v11, %v3002_v11  ;;  %v3010_v22 = vpop.f32.mrb[10].mxu1 }
 0x135   : > { %3620 = vst [vmem:[#allocation6_spill] sm:$0xff] %v3006_v16  ;;  %3621 = vst [vmem:[#allocation7_spill] sm:$0xff] %v3010_v22  ;;  %v1366_v55 = vadd.f32 %v1289_v52, %v1288_v45  ;;  %v1215_v58 = vadd.f32 %v3006_v16, %v2998_v53  ;;  %v1296_v59 = vmul.f32 %v3006_v16, %v3006_v16  ;;  %v3017_v62 = vpop.f32.mrb[11].mxu1 }
 0x136   : > { %v1207_v61 = vadd.f32 %v1206_v50, %v2990_v48  ;;  %3622 = vst [vmem:[#allocation8_spill] sm:$0xff] %v3017_v62  ;;  %v1297_v0 = vmul.f32 %v3010_v22, %v3010_v22  ;;  %v1298_v1 = vmul.f32 %v3017_v62, %v3017_v62 }
 0x137   : > { %v1375_v4 = vadd.f32 %v1296_v59, %v1295_v60  ;;  %v1367_v5 = vadd.f32 %v1366_v55, %v1290_v54  ;;  %v1216_v8 = vadd.f32 %v1215_v58, %v3010_v22 }
 0x138   : > { %v3024_v6 = vadd.f32 %v1207_v61, %v3002_v11 }
 0x139   : > { %v3027_v12 = vadd.f32 %v1367_v5, %v1291_v31  ;;  %v1376_v17 = vadd.f32 %v1375_v4, %v1297_v0  ;;  %v3030_v18 = vadd.f32 %v1216_v8, %v3017_v62  ;;  %v3032_v20 = vpop.f32.mrb[12].mxu0 }
 0x13a   : > { %3623 = vst [vmem:[#allocation9_spill] sm:$0xff] %v3032_v20  ;;  %v1302_v23 = vmul.f32 %v3032_v20, %v3032_v20  ;;  %v3036_v25 = vpop.f32.mrb[13].mxu0  ;;  %v3038_v28 = vpop.f32.mrb[12].mxu1 }
 0x13b   : > { %3624 = vst [vmem:[#allocation10_spill] sm:$0xff] %v3036_v25  ;;  %3625 = vst [vmem:[#allocation11_spill] sm:$0xff] %v3038_v28  ;;  %v3040_v29 = vadd.f32 %v1376_v17, %v1298_v1  ;;  %v1224_v30 = vadd.f32 %v3036_v25, %v3032_v20  ;;  %v1303_v32 = vmul.f32 %v3036_v25, %v3036_v25  ;;  %v3046_v34 = vpop.f32.mrb[14].mxu0  ;;  %v3050_v36 = vpop.f32.mrb[13].mxu1 }
 0x13c   : > { %3626 = vst [vmem:[#allocation12_spill] sm:$0xff] %v3046_v34  ;;  %v1304_v35 = vmul.f32 %v3038_v28, %v3038_v28  ;;  %3627 = vst [vmem:[#allocation13_spill] sm:$0xff] %v3050_v36  ;;  %v1309_v37 = vmul.f32 %v3046_v34, %v3046_v34  ;;  %v3054_v39 = vpop.f32.mrb[15].mxu0  ;;  %v1305_v41 = vmul.f32 %v3050_v36, %v3050_v36  ;;  %v3058_v45 = vpop.f32.mrb[14].mxu1 }
 0x13d   : > { %3628 = vst [vmem:[#allocation14_spill] sm:$0xff] %v3054_v39  ;;  %3629 = vst [vmem:[#allocation15_spill] sm:$0xff] %v3058_v45  ;;  %v1384_v50 = vadd.f32 %v1303_v32, %v1302_v23  ;;  %v1233_v52 = vadd.f32 %v3054_v39, %v3046_v34  ;;  %v1310_v54 = vmul.f32 %v3054_v39, %v3054_v39  ;;  %v3065_v31 = vpop.f32.mrb[15].mxu1 }
 0x13e   : > { %v1225_v60 = vadd.f32 %v1224_v30, %v3038_v28  ;;  %3630 = vst [vmem:[#allocation16_spill] sm:$0xff] %v3065_v31  ;;  %v1311_v55 = vmul.f32 %v3058_v45, %v3058_v45  ;;  %v1312_v58 = vmul.f32 %v3065_v31, %v3065_v31 }
 0x13f   : > { %v1393_v59 = vadd.f32 %v1310_v54, %v1309_v37  ;;  %v1385_v61 = vadd.f32 %v1384_v50, %v1304_v35  ;;  %v1234_v1 = vadd.f32 %v1233_v52, %v3058_v45 }
 0x140   : > { %v3072_v0 = vadd.f32 %v1225_v60, %v3050_v36 }
 0x141   : > { %v3075_v4 = vadd.f32 %v1385_v61, %v1305_v41  ;;  %v1394_v5 = vadd.f32 %v1393_v59, %v1311_v55  ;;  %v3078_v8 = vadd.f32 %v1234_v1, %v3065_v31  ;;  %v3080_v17 = vpop.f32.mrb[16].mxu0 }
 0x142   : > { %3631 = vst [vmem:[#allocation17_spill] sm:$0xff] %v3080_v17  ;;  %v1316_v23 = vmul.f32 %v3080_v17, %v3080_v17  ;;  %v3084_v30 = vpop.f32.mrb[17].mxu0  ;;  %v3086_v32 = vpop.f32.mrb[16].mxu1 }
 0x143   : > { %3632 = vst [vmem:[#allocation18_spill] sm:$0xff] %v3084_v30  ;;  %3633 = vst [vmem:[#allocation19_spill] sm:$0xff] %v3086_v32  ;;  %v3088_v35 = vadd.f32 %v1394_v5, %v1312_v58  ;;  %v1242_v37 = vadd.f32 %v3084_v30, %v3080_v17  ;;  %v1317_v41 = vmul.f32 %v3084_v30, %v3084_v30  ;;  %v3094_v50 = vpop.f32.mrb[18].mxu0  ;;  %v3098_v54 = vpop.f32.mrb[17].mxu1 }
 0x144   : > { %3634 = vst [vmem:[#allocation20_spill] sm:$0xff] %v3094_v50  ;;  %v1318_v52 = vmul.f32 %v3086_v32, %v3086_v32  ;;  %3635 = vst [vmem:[#allocation21_spill] sm:$0xff] %v3098_v54  ;;  %v1323_v60 = vmul.f32 %v3094_v50, %v3094_v50  ;;  %v3102_v55 = vpop.f32.mrb[19].mxu0  ;;  %v1319_v58 = vmul.f32 %v3098_v54, %v3098_v54  ;;  %v3106_v59 = vpop.f32.mrb[18].mxu1 }
 0x145   : > { %3636 = vst [vmem:[#allocation22_spill] sm:$0xff] %v3102_v55  ;;  %3637 = vst [vmem:[#allocation23_spill] sm:$0xff] %v3106_v59  ;;  %v1402_v61 = vadd.f32 %v1317_v41, %v1316_v23  ;;  %v1251_v1 = vadd.f32 %v3102_v55, %v3094_v50  ;;  %v1324_v5 = vmul.f32 %v3102_v55, %v3102_v55  ;;  %v3113_v17 = vpop.f32.mrb[19].mxu1 }
 0x146   : > { %v1243_v30 = vadd.f32 %v1242_v37, %v3086_v32  ;;  %3638 = vst [vmem:[#allocation24_spill] sm:$0xff] %v3113_v17  ;;  %v1325_v31 = vmul.f32 %v3106_v59, %v3106_v59  ;;  %v1326_v45 = vmul.f32 %v3113_v17, %v3113_v17 }
 0x147   : > { %v1411_v39 = vadd.f32 %v1324_v5, %v1323_v60  ;;  %v1403_v34 = vadd.f32 %v1402_v61, %v1318_v52  ;;  %v1252_v41 = vadd.f32 %v1251_v1, %v3106_v59 }
 0x148   : > { %v3120_v23 = vadd.f32 %v1243_v30, %v3098_v54 }
 0x149   : > { %v3123_v50 = vadd.f32 %v1403_v34, %v1319_v58  ;;  %v1412_v55 = vadd.f32 %v1411_v39, %v1325_v31  ;;  %v3126_v37 = vadd.f32 %v1252_v41, %v3113_v17 }
 0x14b   : > { %v3128_v32 = vadd.f32 %v1412_v55, %v1326_v45 }
 0x15d   : > { %v3130_v36 = vpop.f32.mrb[20].mxu0 }
 0x15e   : > { %v1172_v60 = vadd.f32 %v2926_v3, %v3130_v36  ;;  %v1264_v30 = vmul.f32 %v3130_v36, %v3130_v36  ;;  %v3136_v52 = vpop.f32.mrb[20].mxu1  ;;  %v3138_v61 = vpop.f32.mrb[21].mxu0 }
 0x15f   : > { %v1266_v34 = vmul.f32 %v3136_v52, %v3136_v52  ;;  %v1265_v39 = vmul.f32 %v3138_v61, %v3138_v61  ;;  %v1132_v45 = vpop.f32.mrb[21].mxu1  ;;  %v3144_v31 = vpop.f32.mrb[22].mxu0  ;;  %v1175_v55 = vsel %vm1174_vm1, %v3136_v52, 0.0 }
 0x160   : > { %v1182_v3 = vadd.f32 %v2932_v7, %v3144_v31  ;;  %v1271_v58 = vmul.f32 %v3144_v31, %v3144_v31  ;;  %v3152_v1 = vpop.f32.mrb[22].mxu1  ;;  %v3154_v5 = vpop.f32.mrb[23].mxu0  ;;  %v1173_v41 = vadd.f32 %v1172_v60, %v3138_v61  ;;  %v1333_v54 = vadd.f32 %v2929_v44, %v1264_v30 }
 0x161   : > { %v1272_v45 = vmul.f32 %v3154_v5, %v3154_v5  ;;  %v1135_v17 = vpop.f32.mrb[23].mxu1  ;;  %v1273_v59 = vmul.f32 %v3152_v1, %v3152_v1  ;;  %v1335_v7 = vsel %vm1174_vm1, %v1266_v34, 0.0  ;;  %v1184_v60 = vsel %vm1174_vm1, %v3152_v1, 0.0 }
 0x162   : > { %v1176_v28 = vadd.f32 %v1175_v55, %v1173_v41  ;;  %v1342_v25 = vadd.f32 %v2944_v15, %v1271_v58  ;;  %v1183_v20 = vadd.f32 %v1182_v3, %v3154_v5  ;;  %v1334_v62 = vadd.f32 %v1333_v54, %v1265_v39 }
 0x163   : > { %v1344_v17 = vsel %vm1174_vm1, %v1273_v59, 0.0 }
 0x164   : > { %1177 = vadd.xlane.f32.xlu0 %v1176_v28  ;;  %v1343_v44 = vadd.f32 %v1342_v25, %v1272_v45  ;;  %v1185_v30 = vadd.f32 %v1184_v60, %v1183_v20  ;;  %v1336_v22 = vadd.f32 %v1335_v7, %v1334_v62 }
 0x165   : > { %v3167_v16 = vpop.f32.mrb[24].mxu0 }
 0x166   : > { %v1191_v34 = vadd.f32 %v2976_v38, %v3167_v16  ;;  %v1278_v15 = vmul.f32 %v3167_v16, %v3167_v16  ;;  %v3174_v55 = vpop.f32.mrb[25].mxu0  ;;  %v3176_v54 = vpop.f32.mrb[24].mxu1  ;;  %v1345_v39 = vadd.f32 %v1344_v17, %v1343_v44 }
 0x167   : > { %v1279_v25 = vmul.f32 %v3174_v55, %v3174_v55  ;;  %v3180_v20 = vpop.f32.mrb[26].mxu0  ;;  %v1280_v62 = vmul.f32 %v3176_v54, %v3176_v54  ;;  %v1140_v28 = vpop.f32.mrb[25].mxu1  ;;  %v1193_v38 = vsel %vm1174_vm1, %v3176_v54, 0.0 }
 0x168   : > { %v1200_v59 = vadd.f32 %v2982_v42, %v3180_v20  ;;  %v1285_v3 = vmul.f32 %v3180_v20, %v3180_v20  ;;  %1346 = vadd.xlane.f32.xlu1 %v1345_v39  ;;  %1186 = vadd.xlane.f32.xlu0 %v1185_v30  ;;  %v3190_v58 = vpop.f32.mrb[27].mxu0  ;;  %v3192_v41 = vpop.f32.mrb[26].mxu1  ;;  %v1192_v45 = vadd.f32 %v1191_v34, %v3174_v55 }
 0x169   : > { %v1286_v7 = vmul.f32 %v3190_v58, %v3190_v58  ;;  %v1287_v60 = vmul.f32 %v3192_v41, %v3192_v41  ;;  %v1143_v44 = vpop.f32.mrb[27].mxu1  ;;  %v1351_v42 = vadd.f32 %v2979_v40, %v1278_v15  ;;  %v1353_v17 = vsel %vm1174_vm1, %v1280_v62, 0.0 }
 0x16a   : > { %v1194_v28 = vadd.f32 %v1193_v38, %v1192_v45  ;;  %v1201_v30 = vadd.f32 %v1200_v59, %v3190_v58  ;;  %v1202_v39 = vsel %vm1174_vm1, %v3192_v41, 0.0  ;;  %v1360_v53 = vadd.f32 %v2992_v49, %v1285_v3 }
 0x16b   : > { %v1352_v34 = vadd.f32 %v1351_v42, %v1279_v25  ;;  %v1362_v11 = vsel %vm1174_vm1, %v1287_v60, 0.0 }
 0x16c   : > { %1337 = vadd.xlane.f32.xlu0 %v1336_v22  ;;  %1195 = vadd.xlane.f32.xlu1 %v1194_v28  ;;  %v1203_v48 = vadd.f32 %v1202_v39, %v1201_v30  ;;  %v1361_v47 = vadd.f32 %v1360_v53, %v1286_v7 }
 0x16d   : > { %v3206_v44 = vpop.f32.mrb[28].mxu0  ;;  %v1354_v40 = vadd.f32 %v1353_v17, %v1352_v34 }
 0x16e   : > { %v1209_v15 = vadd.f32 %v3024_v6, %v3206_v44  ;;  %v1292_v62 = vmul.f32 %v3206_v44, %v3206_v44  ;;  %v3212_v38 = vpop.f32.mrb[29].mxu0  ;;  %v3214_v59 = vpop.f32.mrb[28].mxu1  ;;  %v1363_v49 = vadd.f32 %v1362_v11, %v1361_v47 }
 0x16f   : > { %3639 = vst [vmem:[#allocation25_spill] sm:$0xff] %v3214_v59  ;;  %v1293_v22 = vmul.f32 %v3212_v38, %v3212_v38  ;;  %v3218_v25 = vpop.f32.mrb[30].mxu0  ;;  %v1294_v53 = vmul.f32 %v3214_v59, %v3214_v59  ;;  %v1148_v3 = vpop.f32.mrb[29].mxu1  ;;  %v1211_v6 = vsel %vm1174_vm1, %v3214_v59, 0.0 }
 0x170   : > { %3640 = vst [vmem:[#allocation26_spill] sm:$0xff] %v3218_v25  ;;  %v1218_v45 = vadd.f32 %v3030_v18, %v3218_v25  ;;  %v1299_v7 = vmul.f32 %v3218_v25, %v3218_v25  ;;  %1355 = vadd.xlane.f32.xlu0 %v1354_v40  ;;  %1204 = vadd.xlane.f32.xlu1 %v1203_v48  ;;  %v3228_v47 = vpop.f32.mrb[31].mxu0  ;;  %v3230_v11 = vpop.f32.mrb[30].mxu1 }
 0x171   : > { %v1210_v60 = vadd.f32 %v1209_v15, %v3212_v38  ;;  %v1300_v42 = vmul.f32 %v3228_v47, %v3228_v47  ;;  %v1301_v17 = vmul.f32 %v3230_v11, %v3230_v11  ;;  %v1151_v28 = vpop.f32.mrb[31].mxu1  ;;  %v1369_v18 = vadd.f32 %v3027_v12, %v1292_v62 }
 0x172   : > { %v1371_v30 = vsel %vm1174_vm1, %v1294_v53, 0.0  ;;  %v1219_v48 = vadd.f32 %v1218_v45, %v3228_v47  ;;  %v1220_v34 = vsel %vm1174_vm1, %v3230_v11, 0.0  ;;  %v1378_v40 = vadd.f32 %v3040_v29, %v1299_v7 }
 0x173   : > { %v1212_v39 = vadd.f32 %v1211_v6, %v1210_v60  ;;  %v1370_v15 = vadd.f32 %v1369_v18, %v1293_v22  ;;  %v1380_v3 = vsel %vm1174_vm1, %v1301_v17, 0.0 }
 0x174   : > { %1364 = vadd.xlane.f32.xlu1 %v1363_v49  ;;  %v1221_v59 = vadd.f32 %v1220_v34, %v1219_v48  ;;  %v1379_v25 = vadd.f32 %v1378_v40, %v1300_v42 }
 0x175   : > { %1213 = vadd.xlane.f32.xlu0 %v1212_v39  ;;  %v3244_v28 = vpop.f32.mrb[32].mxu0  ;;  %v1372_v12 = vadd.f32 %v1371_v30, %v1370_v15 }
 0x176   : > { %v1227_v62 = vadd.f32 %v3072_v0, %v3244_v28  ;;  %v1306_v53 = vmul.f32 %v3244_v28, %v3244_v28  ;;  %v3250_v6 = vpop.f32.mrb[33].mxu0  ;;  %v3252_v45 = vpop.f32.mrb[32].mxu1  ;;  %v1381_v29 = vadd.f32 %v1380_v3, %v1379_v25 }
 0x177   : > { %3641 = vst [vmem:[#allocation27_spill] sm:$0xff] %v3250_v6  ;;  %3642 = vst [vmem:[#allocation28_spill] sm:$0xff] %v3252_v45  ;;  %v1307_v49 = vmul.f32 %v3250_v6, %v3250_v6  ;;  %v3256_v22 = vpop.f32.mrb[34].mxu0  ;;  %v1308_v7 = vmul.f32 %v3252_v45, %v3252_v45  ;;  %v1156_v60 = vpop.f32.mrb[33].mxu1  ;;  %v1229_v0 = vsel %vm1174_vm1, %v3252_v45, 0.0 }
 0x178   : > { %3643 = vst [vmem:[#allocation29_spill] sm:$0xff] %v3256_v22  ;;  %v1236_v42 = vadd.f32 %v3078_v8, %v3256_v22  ;;  %v1313_v17 = vmul.f32 %v3256_v22, %v3256_v22  ;;  %1222 = vadd.xlane.f32.xlu1 %v1221_v59  ;;  %v3266_v25 = vpop.f32.mrb[35].mxu0  ;;  %v3268_v18 = vpop.f32.mrb[34].mxu1  ;;  %v1228_v30 = vadd.f32 %v1227_v62, %v3250_v6 }
 0x179   : > { %1373 = vadd.xlane.f32.xlu0 %v1372_v12  ;;  %3644 = vst [vmem:[#allocation30_spill] sm:$0xff] %v3266_v25  ;;  %3645 = vst [vmem:[#allocation31_spill] sm:$0xff] %v3268_v18  ;;  %v1314_v39 = vmul.f32 %v3266_v25, %v3266_v25  ;;  %v1315_v48 = vmul.f32 %v3268_v18, %v3268_v18  ;;  %v1159_v34 = vpop.f32.mrb[35].mxu1  ;;  %v1387_v8 = vadd.f32 %v3075_v4, %v1306_v53 }
 0x17a   : > { %v1389_v40 = vsel %vm1174_vm1, %v1308_v7, 0.0  ;;  %v1230_v15 = vadd.f32 %v1229_v0, %v1228_v30  ;;  %v1237_v59 = vadd.f32 %v1236_v42, %v3266_v25  ;;  %v1238_v3 = vsel %vm1174_vm1, %v3268_v18, 0.0  ;;  %v1510_v25 = vld [vmem:[%s3352_s6] sm:$0xff] }
 0x17b   : > { %v1396_v12 = vadd.f32 %v3088_v35, %v1313_v17  ;;  %v1388_v62 = vadd.f32 %v1387_v8, %v1307_v49  ;;  %v1398_v60 = vsel %vm1174_vm1, %v1315_v48, 0.0 }
 0x17c   : > { %1382 = vadd.xlane.f32.xlu1 %v1381_v29  ;;  %v1239_v22 = vadd.f32 %v1238_v3, %v1237_v59 }
 0x17d   : > { %1231 = vadd.xlane.f32.xlu0 %v1230_v15  ;;  %v1397_v45 = vadd.f32 %v1396_v12, %v1314_v39  ;;  %v3282_v34 = vpop.f32.mrb[36].mxu0  ;;  %v1390_v4 = vadd.f32 %v1389_v40, %v1388_v62 }
 0x17e   : > { %3646 = vst [vmem:[#allocation32_spill] sm:$0xff] %v3282_v34  ;;  %v1245_v53 = vadd.f32 %v3120_v23, %v3282_v34  ;;  %v1320_v7 = vmul.f32 %v3282_v34, %v3282_v34  ;;  %v3288_v0 = vpop.f32.mrb[37].mxu0  ;;  %v3290_v42 = vpop.f32.mrb[36].mxu1 }
 0x17f   : > { %3647 = vst [vmem:[#allocation33_spill] sm:$0xff] %v3288_v0  ;;  %3648 = vst [vmem:[#allocation34_spill] sm:$0xff] %v3290_v42  ;;  %v1399_v35 = vadd.f32 %v1398_v60, %v1397_v45  ;;  %v1321_v29 = vmul.f32 %v3288_v0, %v3288_v0  ;;  %v3294_v49 = vpop.f32.mrb[38].mxu0  ;;  %v1322_v17 = vmul.f32 %v3290_v42, %v3290_v42  ;;  %v1164_v30 = vpop.f32.mrb[37].mxu1  ;;  %v1247_v23 = vsel %vm1174_vm1, %v3290_v42, 0.0 }
 0x180   : > { %3649 = vst [vmem:[#allocation35_spill] sm:$0xff] %v3294_v49  ;;  %v1254_v39 = vadd.f32 %v3126_v37, %v3294_v49  ;;  %v1327_v48 = vmul.f32 %v3294_v49, %v3294_v49  ;;  %1240 = vadd.xlane.f32.xlu1 %v1239_v22  ;;  %v3304_v45 = vpop.f32.mrb[39].mxu0  ;;  %v3306_v8 = vpop.f32.mrb[38].mxu1  ;;  %v1246_v40 = vadd.f32 %v1245_v53, %v3288_v0 }
 0x181   : > { %1391 = vadd.xlane.f32.xlu0 %v1390_v4  ;;  %3650 = vst [vmem:[#allocation36_spill] sm:$0xff] %v3304_v45  ;;  %3651 = vst [vmem:[#allocation37_spill] sm:$0xff] %v3306_v8  ;;  %v1328_v15 = vmul.f32 %v3304_v45, %v3304_v45  ;;  %v1329_v59 = vmul.f32 %v3306_v8, %v3306_v8  ;;  %v1405_v3 = vadd.f32 %v3123_v50, %v1320_v7  ;;  %v1167_v12 = vpop.f32.mrb[39].mxu1 }
 0x182   : > { %v1407_v37 = vsel %vm1174_vm1, %v1322_v17, 0.0  ;;  %v1255_v62 = vadd.f32 %v1254_v39, %v3304_v45  ;;  %v1248_v22 = vadd.f32 %v1247_v23, %v1246_v40  ;;  %v1256_v60 = vsel %vm1174_vm1, %v3306_v8, 0.0  ;;  %v1493_v45 = vld [vmem:[%s3338_s29 + $0x18] sm:$0xff] }
 0x183   : > { %v1414_v4 = vadd.f32 %v3128_v32, %v1327_v48  ;;  %v1406_v53 = vadd.f32 %v1405_v3, %v1321_v29  ;;  %v1416_v30 = vsel %vm1174_vm1, %v1329_v59, 0.0 }
 0x184   : > { %1400 = vadd.xlane.f32.xlu1 %v1399_v35  ;;  %v1257_v42 = vadd.f32 %v1256_v60, %v1255_v62 }
 0x185   : > { %1249 = vadd.xlane.f32.xlu0 %v1248_v22  ;;  %v1415_v0 = vadd.f32 %v1414_v4, %v1328_v15  ;;  %v1408_v34 = vadd.f32 %v1407_v37, %v1406_v53 }
 0x187   : > { %v1417_v50 = vadd.f32 %v1416_v30, %v1415_v0 }
 0x188   : > { %1258 = vadd.xlane.f32.xlu1 %v1257_v42 }
 0x189   : > { %1409 = vadd.xlane.f32.xlu0 %v1408_v34 }
 0x18c   : > { %1418 = vadd.xlane.f32.xlu1 %v1417_v50 }
 0x1f1   : > { %v1178_v7 = vpop.xlane.xlu0 %1177 }
 0x1f2   : > { %v3320_v39 = vmul.f32 0.0012755102, %v1178_v7 }
 0x1f4   : > { %v1440_v35 = vmul.f32 %v3320_v39, %v3320_v39 }
 0x1f5   : > { %v1347_v17 = vpop.xlane.xlu1 %1346  ;;  %v1187_v23 = vpop.xlane.xlu0 %1186 }
 0x1f6   : > { %v1421_v40 = vmul.f32 0.0012755102, %v1187_v23  ;;  %v1431_v12 = vmul.f32 0.0012755102, %v1347_v17 }
 0x1f8   : > { %v1441_v32 = vmul.f32 %v1421_v40, %v1421_v40 }
 0x1f9   : > { %v1338_v29 = vpop.xlane.xlu0 %1337  ;;  %v1196_v48 = vpop.xlane.xlu1 %1195 }
 0x1fa   : > { %v1451_v59 = vsub.f32 %v1431_v12, %v1441_v32  ;;  %v1430_v15 = vmul.f32 0.0012755102, %v1338_v29  ;;  %v3324_v3 = vmul.f32 0.0012755102, %v1196_v48 }
 0x1fc   : > { %v1461_v34 = vmax.f32 %v1451_v59, 0.0  ;;  %v1450_v0 = vsub.f32 %v1430_v15, %v1440_v35  ;;  %v1442_v60 = vmul.f32 %v3324_v3, %v3324_v3 }
 0x1fd   : > { %v1356_v42 = vpop.xlane.xlu0 %1355  ;;  %v1205_v37 = vpop.xlane.xlu1 %1204 }
 0x1fe   : > { %v1471_v62 = vadd.f32 1e-05, %v1461_v34  ;;  %v1460_v22 = vmax.f32 %v1450_v0, 0.0  ;;  %v1432_v4 = vmul.f32 0.0012755102, %v1356_v42 }
 0x1ff   : > { %v3328_v53 = vmul.f32 0.0012755102, %v1205_v37 }
 0x200   : > { %2072 = vrsqrt.f32 %v1471_v62  ;;  %v1470_v30 = vadd.f32 1e-05, %v1460_v22  ;;  %v1452_v50 = vsub.f32 %v1432_v4, %v1442_v60  ;;  %v1491_v62 = vld [vmem:[%s3338_s29 + $0x8] sm:$0xff] }
 0x201   : > { %v1443_v7 = vmul.f32 %v3328_v53, %v3328_v53  ;;  %v1365_v17 = vpop.xlane.xlu1 %1364 }
 0x202   : > { %v1214_v23 = vpop.xlane.xlu0 %1213  ;;  %2074 = vrsqrt.f32 %v1470_v30  ;;  %v1462_v12 = vmax.f32 %v1452_v50, 0.0  ;;  %v1433_v32 = vmul.f32 0.0012755102, %v1365_v17 }
 0x203   : > { %v3332_v29 = vmul.f32 0.0012755102, %v1214_v23  ;;  %v1490_v23 = vld [vmem:[%s3338_s29] sm:$0xff] }
 0x204   : > { %v1472_v48 = vadd.f32 1e-05, %v1462_v12  ;;  %v1453_v35 = vsub.f32 %v1433_v32, %v1443_v7 }
 0x205   : > { %v1223_v15 = vpop.xlane.xlu1 %1222  ;;  %v1444_v0 = vmul.f32 %v3332_v29, %v3332_v29 }
 0x206   : > { %v1374_v59 = vpop.xlane.xlu0 %1373  ;;  %v1463_v34 = vmax.f32 %v1453_v35, 0.0  ;;  %v3342_v37 = vmul.f32 0.0012755102, %v1223_v15  ;;  %2076 = vrsqrt.f32 %v1472_v48 }
 0x207   : > { %v1434_v42 = vmul.f32 0.0012755102, %v1374_v59 }
 0x208   : > { %v1473_v22 = vadd.f32 1e-05, %v1463_v34  ;;  %v1445_v7 = vmul.f32 %v3342_v37, %v3342_v37 }
 0x209   : > { %v1454_v60 = vsub.f32 %v1434_v42, %v1444_v0  ;;  %v1383_v4 = vpop.xlane.xlu1 %1382  ;;  %v1511_v42 = vld [vmem:[%s3352_s6 + $0x8] sm:$0xff] }
 0x20a   : > { %v1232_v30 = vpop.xlane.xlu0 %1231  ;;  %v2073_v50 = vpop.eup %2072  ;;  %2078 = vrsqrt.f32 %v1473_v22  ;;  %v1435_v17 = vmul.f32 0.0012755102, %v1383_v4 }
 0x20b   : > { %v1501_v12 = vmul.f32 %v2073_v50, %v1491_v62  ;;  %v1464_v48 = vmax.f32 %v1454_v60, 0.0  ;;  %v3355_v4 = vmul.f32 0.0012755102, %v1232_v30 }
 0x20c   : > { %v2075_v32 = vpop.eup %2074  ;;  %v1455_v35 = vsub.f32 %v1435_v17, %v1445_v7 }
 0x20d   : > { %v1521_v59 = vmul.f32 %v1501_v12, %v1421_v40  ;;  %v1241_v34 = vpop.xlane.xlu1 %1240  ;;  %1547 = vperm.xlu1 %2056, %v1501_v12   ;;  %v1500_v0 = vmul.f32 %v2075_v32, %v1490_v23  ;;  %v1474_v50 = vadd.f32 1e-05, %v1464_v48  ;;  %v1446_v30 = vmul.f32 %v3355_v4, %v3355_v4 }
 0x20e   : > { %v1392_v15 = vpop.xlane.xlu0 %1391  ;;  %v1465_v22 = vmax.f32 %v1455_v35, 0.0  ;;  %v3357_v18 = vmul.f32 0.0012755102, %v1241_v34  ;;  %v1492_v34 = vld [vmem:[%s3338_s29 + $0x10] sm:$0xff] }
 0x20f   : > { %1542 = vperm.xlu0 %2055, %v1500_v0   ;;  %v1520_v62 = vmul.f32 %v1500_v0, %v3320_v39  ;;  %v1436_v7 = vmul.f32 0.0012755102, %v1392_v15  ;;  %v1531_v8 = vsub.f32 %v1511_v42, %v1521_v59 }
 0x210   : > { %v1475_v60 = vadd.f32 1e-05, %v1465_v22  ;;  %v2077_v23 = vpop.eup %2076  ;;  %v1447_v32 = vmul.f32 %v3357_v18, %v3357_v18 }
 0x211   : > { %v1401_v40 = vpop.xlane.xlu1 %1400  ;;  %v1530_v12 = vsub.f32 %v1510_v25, %v1520_v62  ;;  %v1456_v48 = vsub.f32 %v1436_v7, %v1446_v30  ;;  %v1502_v0 = vmul.f32 %v2077_v23, %v1492_v34 }
 0x212   : > { %v1250_v17 = vpop.xlane.xlu0 %1249  ;;  %2080 = vrsqrt.f32 %v1475_v60  ;;  %v1437_v35 = vmul.f32 0.0012755102, %v1401_v40  ;;  %v1513_v40 = vld [vmem:[%s3352_s6 + $0x18] sm:$0xff] }
 0x213   : > { %1667 = vperm.xlu0 %2055, %v1531_v8   ;;  %1662 = vperm.xlu1 %2056, %v1530_v12   ;;  %2082 = vrsqrt.f32 %v1474_v50  ;;  %v3367_v62 = vmul.f32 0.0012755102, %v1250_v17  ;;  %v1466_v8 = vmax.f32 %v1456_v48, 0.0  ;;  %v1522_v30 = vmul.f32 %v1502_v0, %v3324_v3 }
 0x214   : > { %v2079_v39 = vpop.eup %2078  ;;  %v1457_v15 = vsub.f32 %v1437_v35, %v1447_v32  ;;  %v1512_v32 = vld [vmem:[%s3352_s6 + $0x10] sm:$0xff]  ;;  %v1495_v35 = vld [vmem:[%s3338_s29 + $0x28] sm:$0xff] }
 0x215   : > { %v1259_v25 = vpop.xlane.xlu1 %1258  ;;  %v1503_v42 = vmul.f32 %v2079_v39, %v1493_v45  ;;  %v1448_v45 = vmul.f32 %v3367_v62, %v3367_v62  ;;  %v1476_v34 = vadd.f32 1e-05, %v1466_v8 }
 0x216   : > { %v1410_v59 = vpop.xlane.xlu0 %1409  ;;  %v1467_v22 = vmax.f32 %v1457_v15, 0.0  ;;  %v1429_v60 = vmul.f32 0.0012755102, %v1259_v25  ;;  %v1515_v25 = vld [vmem:[%s3352_s6 + $0x28] sm:$0xff] }
 0x217   : > { %1552 = vperm.xlu1 %2056, %v1502_v0   ;;  %v1523_v49 = vmul.f32 %v1503_v42, %v3328_v53  ;;  %v1438_v6 = vmul.f32 0.0012755102, %v1410_v59  ;;  %v1494_v0 = vld [vmem:[%s3338_s29 + $0x20] sm:$0xff] }
 0x218   : > { %v1477_v12 = vadd.f32 1e-05, %v1467_v22  ;;  %v1449_v17 = vmul.f32 %v1429_v60, %v1429_v60 }
 0x219   : > { %v1419_v50 = vpop.xlane.xlu1 %1418  ;;  %v1533_v7 = vsub.f32 %v1513_v40, %v1523_v49  ;;  %v1458_v39 = vsub.f32 %v1438_v6, %v1448_v45  ;;  %v1532_v49 = vsub.f32 %v1512_v32, %v1522_v30  ;;  %v1497_v6 = vld [vmem:[%s3338_s29 + $0x38] sm:$0xff] }
 0x21a   : > { %2084 = vrsqrt.f32 %v1477_v12  ;;  %v1439_v23 = vmul.f32 0.0012755102, %v1419_v50 }
 0x21b   : > { %1677 = vperm.xlu0 %2055, %v1533_v7   ;;  %1557 = vperm.xlu1 %2056, %v1503_v42   ;;  %2086 = vrsqrt.f32 %v1476_v34  ;;  %v1468_v40 = vmax.f32 %v1458_v39, 0.0  ;;  %v1496_v34 = vld [vmem:[%s3338_s29 + $0x30] sm:$0xff]  ;;  %v1499_v39 = vld [vmem:[%s3338_s29 + $0x48] sm:$0xff] }
 0x21c   : > { %v2081_v53 = vpop.eup %2080  ;;  %v1459_v48 = vsub.f32 %v1439_v23, %v1449_v17  ;;  %v1517_v17 = vld [vmem:[%s3352_s6 + $0x38] sm:$0xff]  ;;  %v1514_v23 = vld [vmem:[%s3352_s6 + $0x20] sm:$0xff] }
 0x21d   : > { %v1505_v15 = vmul.f32 %v2081_v53, %v1495_v35  ;;  %v2083_v3 = vpop.eup %2082  ;;  %v1478_v7 = vadd.f32 1e-05, %v1468_v40 }
 0x21e   : > { %v1469_v59 = vmax.f32 %v1459_v48, 0.0  ;;  %v1504_v50 = vmul.f32 %v2083_v3, %v1494_v0  ;;  %v1516_v0 = vld [vmem:[%s3352_s6 + $0x30] sm:$0xff] }
 0x21f   : > { %1672 = vperm.xlu1 %2056, %v1532_v49   ;;  %v1525_v22 = vmul.f32 %v1505_v15, %v3342_v37 }
 0x220   : > { %v1479_v12 = vadd.f32 1e-05, %v1469_v59  ;;  %v1524_v45 = vmul.f32 %v1504_v50, %v3332_v29  ;;  %v1519_v29 = vld [vmem:[%s3352_s6 + $0x48] sm:$0xff] }
 0x221   : > { %v1535_v42 = vsub.f32 %v1515_v25, %v1525_v22  ;;  %v1498_v22 = vld [vmem:[%s3338_s29 + $0x40] sm:$0xff] }
 0x222   : > { %2088 = vrsqrt.f32 %v1479_v12  ;;  %v1534_v35 = vsub.f32 %v1514_v23, %v1524_v45 }
 0x223   : > { %1687 = vperm.xlu0 %2055, %v1535_v42   ;;  %1562 = vperm.xlu1 %2056, %v1504_v50   ;;  %2090 = vrsqrt.f32 %v1478_v7  ;;  %v1518_v50 = vld [vmem:[%s3352_s6 + $0x40] sm:$0xff] }
 0x224   : > { %v2085_v8 = vpop.eup %2084 }
 0x225   : > { %v1507_v30 = vmul.f32 %v2085_v8, %v1497_v6  ;;  %v2087_v53 = vpop.eup %2086 }
 0x226   : > { %v1506_v49 = vmul.f32 %v2087_v53, %v1496_v34 }
 0x227   : > { %1567 = vperm.xlu1 %2056, %v1505_v15   ;;  %v1527_v37 = vmul.f32 %v1507_v30, %v3357_v18 }
 0x228   : > { %v1526_v18 = vmul.f32 %v1506_v49, %v3355_v4 }
 0x229   : > { %v1537_v32 = vsub.f32 %v1517_v17, %v1527_v37 }
 0x22a   : > { %v1536_v40 = vsub.f32 %v1516_v0, %v1526_v18 }
 0x22b   : > { %1697 = vperm.xlu0 %2055, %v1537_v32   ;;  %1682 = vperm.xlu1 %2056, %v1534_v35  }
 0x22c   : > { %v2089_v48 = vpop.eup %2088 }
 0x22d   : > { %v1509_v3 = vmul.f32 %v2089_v48, %v1499_v39  ;;  %v2091_v25 = vpop.eup %2090 }
 0x22e   : > { %v1508_v12 = vmul.f32 %v2091_v25, %v1498_v22 }
 0x22f   : > { %1572 = vperm.xlu1 %2056, %v1506_v49   ;;  %1587 = vperm.xlu0 %2055, %v1509_v3   ;;  %v1529_v15 = vmul.f32 %v1509_v3, %v1429_v60 }
 0x230   : > { %v1528_v42 = vmul.f32 %v1508_v12, %v3367_v62 }
 0x231   : > { %v1539_v59 = vsub.f32 %v1519_v29, %v1529_v15 }
 0x232   : > { %v1538_v6 = vsub.f32 %v1518_v50, %v1528_v42 }
 0x233   : > { %1577 = vperm.xlu1 %2056, %v1507_v30   ;;  %1707 = vperm.xlu0 %2055, %v1539_v59  }
 0x237   : > { %1692 = vperm.xlu1 %2056, %v1536_v40  }
 0x23b   : > { %1582 = vperm.xlu1 %2056, %v1508_v12  }
 0x23f   : > { %1702 = vperm.xlu1 %2056, %v1538_v6  }
 0x28c   : > { %v1548_v8 = vpop.permute.xlu1 %1547 }
 0x28d   : > { %v1597_v7 = vmul.f32 %v1548_v8, %v2904_v51  ;;  %v1598_v4 = vmul.f32 %v1548_v8, %v2912_v56  ;;  %v1599_v45 = vmul.f32 %v1548_v8, %v2914_v57  ;;  %v1600_v30 = vmul.f32 %v1548_v8, %v2921_v63 }
 0x28e   : > { %v1543_v60 = vpop.permute.xlu0 %1542  ;;  %v1601_v17 = vmul.f32 %v1548_v8, %v3144_v31  ;;  %v1602_v23 = vmul.f32 %v1548_v8, %v3154_v5  ;;  %v1603_v62 = vmul.f32 %v1548_v8, %v3152_v1 }
 0x28f   : > { %v1590_v37 = vmul.f32 %v1543_v60, %v2890_v9  ;;  %v1591_v32 = vmul.f32 %v1543_v60, %v2894_v27  ;;  %v1592_v35 = vmul.f32 %v1543_v60, %v2896_v46  ;;  %v1593_v51 = vmul.f32 %v1543_v60, %v2906_v2 }
 0x290   : > { %v1594_v56 = vmul.f32 %v1543_v60, %v3130_v36  ;;  %v1595_v57 = vmul.f32 %v1543_v60, %v3138_v61  ;;  %v1596_v63 = vmul.f32 %v1543_v60, %v3136_v52 }
 0x292   : > { %v1668_v53 = vpop.permute.xlu0 %1667  ;;  %v1663_v31 = vpop.permute.xlu1 %1662 }
 0x293   : > { %v1717_v34 = vadd.f32 %v1668_v53, %v1597_v7  ;;  %v1718_v5 = vadd.f32 %v1668_v53, %v1598_v4  ;;  %v1719_v39 = vadd.f32 %v1668_v53, %v1599_v45  ;;  %v1720_v1 = vadd.f32 %v1668_v53, %v1600_v30 }
 0x294   : > { %v1721_v9 = vadd.f32 %v1668_v53, %v1601_v17  ;;  %v1722_v27 = vadd.f32 %v1668_v53, %v1602_v23  ;;  %v1723_v46 = vadd.f32 %v1668_v53, %v1603_v62  ;;  %v1710_v2 = vadd.f32 %v1663_v31, %v1590_v37 }
 0x295   : > { %v1787_v36 = vmax.f32 %v1717_v34, 0.0  ;;  %v1788_v52 = vmax.f32 %v1718_v5, 0.0  ;;  %v1789_v61 = vmax.f32 %v1719_v39, 0.0  ;;  %v1790_v48 = vmax.f32 %v1720_v1, 0.0 }
 0x296   : > { %v1791_v49 = vmax.f32 %v1721_v9, 0.0  ;;  %v1792_v3 = vmax.f32 %v1722_v27, 0.0  ;;  %v1793_v29 = vmax.f32 %v1723_v46, 0.0  ;;  %v1711_v15 = vadd.f32 %v1663_v31, %v1591_v32  ;;  %v1553_v59 = vpop.permute.xlu1 %1552 }
 0x297   : > { %1857 = vst [vmem:[%s3410_s8 + $0x38] sm:$0xff] %v1787_v36  ;;  %1858 = vst [vmem:[%s3410_s8 + $0x40] sm:$0xff] %v1788_v52  ;;  %v1712_v18 = vadd.f32 %v1663_v31, %v1592_v35  ;;  %v1713_v25 = vadd.f32 %v1663_v31, %v1593_v51  ;;  %v1714_v0 = vadd.f32 %v1663_v31, %v1594_v56  ;;  %v1780_v12 = vmax.f32 %v1710_v2, 0.0 }
 0x298   : > { %1859 = vst [vmem:[%s3410_s8 + $0x48] sm:$0xff] %v1789_v61  ;;  %1860 = vst [vmem:[%s3410_s8 + $0x50] sm:$0xff] %v1790_v48  ;;  %v1715_v22 = vadd.f32 %v1663_v31, %v1595_v57  ;;  %v1716_v40 = vadd.f32 %v1663_v31, %v1596_v63  ;;  %v1781_v42 = vmax.f32 %v1711_v15, 0.0  ;;  %v1604_v4 = vmul.f32 %v1553_v59, %v2936_v10 }
 0x299   : > { %1861 = vst [vmem:[%s3410_s8 + $0x58] sm:$0xff] %v1791_v49  ;;  %1862 = vst [vmem:[%s3410_s8 + $0x60] sm:$0xff] %v1792_v3  ;;  %v1782_v50 = vmax.f32 %v1712_v18, 0.0  ;;  %v1783_v6 = vmax.f32 %v1713_v25, 0.0  ;;  %v1784_v8 = vmax.f32 %v1714_v0, 0.0  ;;  %v1605_v45 = vmul.f32 %v1553_v59, %v2940_v13  ;;  %v3652_v0 = vld [vmem:[#allocation2_spill] sm:$0xff] }
 0x29a   : > { %1863 = vst.msk [vmem:[%s3410_s8 + $0x68] sm:$0xff] %vm1174_vm1, %v1793_v29  ;;  %v1785_v60 = vmax.f32 %v1715_v22, 0.0  ;;  %v1786_v7 = vmax.f32 %v1716_v40, 0.0  ;;  %1850 = vst [vmem:[%s3410_s8] sm:$0xff] %v1780_v12  ;;  %v1606_v30 = vmul.f32 %v1553_v59, %v2942_v14  ;;  %v1558_v17 = vpop.permute.xlu1 %1557  ;;  %v1607_v23 = vmul.f32 %v1553_v59, %v2954_v21  ;;  %v1678_v10 = vpop.permute.xlu0 %1677  ;;  %v3653_v40 = vld [vmem:[#allocation3_spill] sm:$0xff] }
 0x29b   : > { %1851 = vst [vmem:[%s3410_s8 + $0x8] sm:$0xff] %v1781_v42  ;;  %1852 = vst [vmem:[%s3410_s8 + $0x10] sm:$0xff] %v1782_v50  ;;  %v1608_v62 = vmul.f32 %v1553_v59, %v3167_v16  ;;  %v1609_v37 = vmul.f32 %v1553_v59, %v3174_v55  ;;  %v1611_v32 = vmul.f32 %v1558_v17, %v2950_v19  ;;  %v3654_v42 = vld [vmem:[#allocation5_spill] sm:$0xff] }
 0x29c   : > { %1853 = vst [vmem:[%s3410_s8 + $0x18] sm:$0xff] %v1783_v6  ;;  %1854 = vst [vmem:[%s3410_s8 + $0x20] sm:$0xff] %v1784_v8  ;;  %v1612_v13 = vmul.f32 %v1558_v17, %v2958_v24  ;;  %v1613_v14 = vmul.f32 %v1558_v17, %v2962_v26  ;;  %v1614_v35 = vmul.f32 %v1558_v17, %v2969_v33 }
 0x29d   : > { %1855 = vst [vmem:[%s3410_s8 + $0x28] sm:$0xff] %v1785_v60  ;;  %1856 = vst.msk [vmem:[%s3410_s8 + $0x30] sm:$0xff] %vm1174_vm1, %v1786_v7  ;;  %v1615_v51 = vmul.f32 %v1558_v17, %v3180_v20  ;;  %v1610_v56 = vmul.f32 %v1553_v59, %v3176_v54  ;;  %v1616_v21 = vmul.f32 %v1558_v17, %v3190_v58  ;;  %v3655_v60 = vld [vmem:[#allocation4_spill] sm:$0xff] }
 0x29e   : > { %v1617_v16 = vmul.f32 %v1558_v17, %v3192_v41  ;;  %v1731_v55 = vadd.f32 %v1678_v10, %v1611_v32  ;;  %v1732_v19 = vadd.f32 %v1678_v10, %v1612_v13  ;;  %v1733_v57 = vadd.f32 %v1678_v10, %v1613_v14  ;;  %v1673_v24 = vpop.permute.xlu1 %1672  ;;  %v3658_v17 = vld [vmem:[#allocation8_spill] sm:$0xff] }
 0x29f   : > { %v1734_v63 = vadd.f32 %v1678_v10, %v1614_v35  ;;  %v1735_v53 = vadd.f32 %v1678_v10, %v1615_v51  ;;  %v1736_v26 = vadd.f32 %v1678_v10, %v1616_v21  ;;  %v1724_v31 = vadd.f32 %v1673_v24, %v1604_v4  ;;  %v3656_v4 = vld [vmem:[#allocation6_spill] sm:$0xff] }
 0x2a0   : > { %v1737_v33 = vadd.f32 %v1678_v10, %v1617_v16  ;;  %v1801_v20 = vmax.f32 %v1731_v55, 0.0  ;;  %v1802_v54 = vmax.f32 %v1732_v19, 0.0  ;;  %v1803_v34 = vmax.f32 %v1733_v57, 0.0 }
 0x2a1   : > { %v1804_v58 = vmax.f32 %v1734_v63, 0.0  ;;  %v1805_v41 = vmax.f32 %v1735_v53, 0.0  ;;  %v1806_v5 = vmax.f32 %v1736_v26, 0.0  ;;  %v1725_v1 = vadd.f32 %v1673_v24, %v1605_v45 }
 0x2a2   : > { %v1807_v39 = vmax.f32 %v1737_v33, 0.0  ;;  %1871 = vst [vmem:[%s3410_s8 + $0xa8] sm:$0xff] %v1801_v20  ;;  %v1726_v9 = vadd.f32 %v1673_v24, %v1606_v30  ;;  %1872 = vst [vmem:[%s3410_s8 + $0xb0] sm:$0xff] %v1802_v54  ;;  %v1727_v27 = vadd.f32 %v1673_v24, %v1607_v23  ;;  %v1728_v46 = vadd.f32 %v1673_v24, %v1608_v62  ;;  %v1563_v52 = vpop.permute.xlu1 %1562  ;;  %v1688_v25 = vpop.permute.xlu0 %1687 }
 0x2a3   : > { %1873 = vst [vmem:[%s3410_s8 + $0xb8] sm:$0xff] %v1803_v34  ;;  %1874 = vst [vmem:[%s3410_s8 + $0xc0] sm:$0xff] %v1804_v58  ;;  %v1729_v2 = vadd.f32 %v1673_v24, %v1609_v37  ;;  %v1730_v36 = vadd.f32 %v1673_v24, %v1610_v56  ;;  %v1794_v61 = vmax.f32 %v1724_v31, 0.0  ;;  %v1795_v48 = vmax.f32 %v1725_v1, 0.0  ;;  %v3659_v37 = vld [vmem:[#allocation26_spill] sm:$0xff]  ;;  %v3660_v56 = vld [vmem:[#allocation25_spill] sm:$0xff] }
 0x2a4   : > { %1875 = vst [vmem:[%s3410_s8 + $0xc8] sm:$0xff] %v1805_v41  ;;  %1876 = vst [vmem:[%s3410_s8 + $0xd0] sm:$0xff] %v1806_v5  ;;  %v1796_v49 = vmax.f32 %v1726_v9, 0.0  ;;  %v1797_v3 = vmax.f32 %v1727_v27, 0.0  ;;  %v1798_v29 = vmax.f32 %v1728_v46, 0.0  ;;  %v1618_v18 = vmul.f32 %v1563_v52, %v2984_v43  ;;  %v3657_v43 = vld [vmem:[#allocation7_spill] sm:$0xff] }
 0x2a5   : > { %1877 = vst.msk [vmem:[%s3410_s8 + $0xd8] sm:$0xff] %vm1174_vm1, %v1807_v39  ;;  %v1799_v15 = vmax.f32 %v1729_v2, 0.0  ;;  %v1800_v59 = vmax.f32 %v1730_v36, 0.0  ;;  %1864 = vst [vmem:[%s3410_s8 + $0x70] sm:$0xff] %v1794_v61  ;;  %v1619_v22 = vmul.f32 %v1563_v52, %v3652_v0  ;;  %v1620_v12 = vmul.f32 %v1563_v52, %v3653_v40 }
 0x2a6   : > { %1865 = vst [vmem:[%s3410_s8 + $0x78] sm:$0xff] %v1795_v48  ;;  %1866 = vst [vmem:[%s3410_s8 + $0x80] sm:$0xff] %v1796_v49  ;;  %v1621_v50 = vmul.f32 %v1563_v52, %v3654_v42  ;;  %v1622_v6 = vmul.f32 %v1563_v52, %v3206_v44  ;;  %v1568_v8 = vpop.permute.xlu1 %1567  ;;  %v1623_v62 = vmul.f32 %v1563_v52, %v3212_v38  ;;  %v3661_v48 = vld [vmem:[#allocation9_spill] sm:$0xff] }
 0x2a7   : > { %1867 = vst [vmem:[%s3410_s8 + $0x88] sm:$0xff] %v1797_v3  ;;  %1868 = vst [vmem:[%s3410_s8 + $0x90] sm:$0xff] %v1798_v29  ;;  %v1625_v7 = vmul.f32 %v1568_v8, %v3655_v60  ;;  %v1626_v45 = vmul.f32 %v1568_v8, %v3656_v4  ;;  %v1627_v30 = vmul.f32 %v1568_v8, %v3657_v43  ;;  %v3662_v3 = vld [vmem:[#allocation10_spill] sm:$0xff] }
 0x2a8   : > { %1869 = vst [vmem:[%s3410_s8 + $0x98] sm:$0xff] %v1799_v15  ;;  %1870 = vst.msk [vmem:[%s3410_s8 + $0xa0] sm:$0xff] %vm1174_vm1, %v1800_v59  ;;  %v1628_v23 = vmul.f32 %v1568_v8, %v3658_v17  ;;  %v1629_v32 = vmul.f32 %v1568_v8, %v3659_v37  ;;  %v1630_v10 = vmul.f32 %v1568_v8, %v3228_v47  ;;  %v3663_v15 = vld [vmem:[#allocation11_spill] sm:$0xff] }
 0x2a9   : > { %v1631_v13 = vmul.f32 %v1568_v8, %v3230_v11  ;;  %v1745_v14 = vadd.f32 %v1688_v25, %v1625_v7  ;;  %v1746_v35 = vadd.f32 %v1688_v25, %v1626_v45  ;;  %v1747_v44 = vadd.f32 %v1688_v25, %v1627_v30  ;;  %v3668_v8 = vld [vmem:[#allocation22_spill] sm:$0xff]  ;;  %v3669_v7 = vld [vmem:[#allocation23_spill] sm:$0xff]  ;;  %v3670_v30 = vld [vmem:[#allocation24_spill] sm:$0xff] }
 0x2aa   : > { %v1748_v51 = vadd.f32 %v1688_v25, %v1628_v23  ;;  %v1624_v21 = vmul.f32 %v1563_v52, %v3660_v56  ;;  %v1749_v16 = vadd.f32 %v1688_v25, %v1629_v32  ;;  %v1750_v55 = vadd.f32 %v1688_v25, %v1630_v10  ;;  %v3472_v38 = vpop.permute.xlu0 %1697  ;;  %v1683_v57 = vpop.permute.xlu1 %1682  ;;  %v3671_v17 = vld [vmem:[#allocation35_spill] sm:$0xff]  ;;  %v3673_v32 = vld [vmem:[#allocation37_spill] sm:$0xff] }
 0x2ab   : > { %v1751_v19 = vadd.f32 %v1688_v25, %v1631_v13  ;;  %v1815_v63 = vmax.f32 %v1745_v14, 0.0  ;;  %v1816_v47 = vmax.f32 %v1746_v35, 0.0  ;;  %v1817_v11 = vmax.f32 %v1747_v44, 0.0  ;;  %v3674_v44 = vld [vmem:[#allocation12_spill] sm:$0xff] }
 0x2ac   : > { %v1818_v53 = vmax.f32 %v1748_v51, 0.0  ;;  %v1819_v24 = vmax.f32 %v1749_v16, 0.0  ;;  %v1820_v26 = vmax.f32 %v1750_v55, 0.0  ;;  %v1738_v20 = vadd.f32 %v1683_v57, %v1618_v18  ;;  %v3664_v18 = vld [vmem:[#allocation13_spill] sm:$0xff] }
 0x2ad   : > { %v1821_v33 = vmax.f32 %v1751_v19, 0.0  ;;  %1885 = vst [vmem:[%s3410_s8 + $0x118] sm:$0xff] %v1815_v63  ;;  %1886 = vst [vmem:[%s3410_s8 + $0x120] sm:$0xff] %v1816_v47  ;;  %v1739_v31 = vadd.f32 %v1683_v57, %v1619_v22  ;;  %v1740_v54 = vadd.f32 %v1683_v57, %v1620_v12  ;;  %v1741_v34 = vadd.f32 %v1683_v57, %v1621_v50  ;;  %v3665_v22 = vld [vmem:[#allocation27_spill] sm:$0xff]  ;;  %v3666_v12 = vld [vmem:[#allocation28_spill] sm:$0xff] }
 0x2ae   : > { %1887 = vst [vmem:[%s3410_s8 + $0x128] sm:$0xff] %v1817_v11  ;;  %1888 = vst [vmem:[%s3410_s8 + $0x130] sm:$0xff] %v1818_v53  ;;  %v1742_v58 = vadd.f32 %v1683_v57, %v1622_v6  ;;  %v1743_v41 = vadd.f32 %v1683_v57, %v1623_v62  ;;  %v1744_v5 = vadd.f32 %v1683_v57, %v1624_v21  ;;  %v1808_v39 = vmax.f32 %v1738_v20, 0.0  ;;  %v1588_v1 = vpop.permute.xlu0 %1587  ;;  %v1573_v9 = vpop.permute.xlu1 %1572  ;;  %v3667_v50 = vld [vmem:[#allocation20_spill] sm:$0xff]  ;;  %v3675_v47 = vld [vmem:[#allocation14_spill] sm:$0xff] }
 0x2af   : > { %1889 = vst [vmem:[%s3410_s8 + $0x138] sm:$0xff] %v1819_v24  ;;  %1890 = vst [vmem:[%s3410_s8 + $0x140] sm:$0xff] %v1820_v26  ;;  %v1809_v27 = vmax.f32 %v1739_v31, 0.0  ;;  %v1810_v46 = vmax.f32 %v1740_v54, 0.0  ;;  %v1811_v2 = vmax.f32 %v1741_v34, 0.0  ;;  %v1632_v49 = vmul.f32 %v1573_v9, %v3661_v48  ;;  %v3672_v62 = vld [vmem:[#allocation36_spill] sm:$0xff] }
 0x2b0   : > { %1891 = vst.msk [vmem:[%s3410_s8 + $0x148] sm:$0xff] %vm1174_vm1, %v1821_v33  ;;  %v1812_v36 = vmax.f32 %v1742_v58, 0.0  ;;  %v1813_v52 = vmax.f32 %v1743_v41, 0.0  ;;  %v1814_v61 = vmax.f32 %v1744_v5, 0.0  ;;  %1878 = vst [vmem:[%s3410_s8 + $0xe0] sm:$0xff] %v1808_v39  ;;  %v1633_v29 = vmul.f32 %v1573_v9, %v3662_v3  ;;  %v3676_v31 = vld [vmem:[#allocation15_spill] sm:$0xff] }
 0x2b1   : > { %1879 = vst [vmem:[%s3410_s8 + $0xe8] sm:$0xff] %v1809_v27  ;;  %1880 = vst [vmem:[%s3410_s8 + $0xf0] sm:$0xff] %v1810_v46  ;;  %v3490_v59 = vmul.f32 %v1573_v9, %v3663_v15  ;;  %v3493_v25 = vmul.f32 %v1573_v9, %v3664_v18  ;;  %v3496_v0 = vmul.f32 %v1573_v9, %v3244_v28  ;;  %v3677_v34 = vld [vmem:[#allocation16_spill] sm:$0xff]  ;;  %v3678_v41 = vld [vmem:[#allocation29_spill] sm:$0xff] }
 0x2b2   : > { %1881 = vst [vmem:[%s3410_s8 + $0xf8] sm:$0xff] %v1811_v2  ;;  %1882 = vst [vmem:[%s3410_s8 + $0x100] sm:$0xff] %v1812_v36  ;;  %v3499_v40 = vmul.f32 %v1573_v9, %v3665_v22  ;;  %v3505_v42 = vmul.f32 %v1573_v9, %v3666_v12  ;;  %v1653_v6 = vmul.f32 %v1588_v1, %v3667_v50  ;;  %v1708_v45 = vpop.permute.xlu0 %1707  ;;  %v1578_v43 = vpop.permute.xlu1 %1577  ;;  %v3679_v39 = vld [vmem:[#allocation30_spill] sm:$0xff]  ;;  %v3680_v9 = vld [vmem:[#allocation31_spill] sm:$0xff] }
 0x2b3   : > { %1883 = vst [vmem:[%s3410_s8 + $0x108] sm:$0xff] %v1813_v52  ;;  %1884 = vst.msk [vmem:[%s3410_s8 + $0x110] sm:$0xff] %vm1174_vm1, %v1814_v61  ;;  %v1654_v60 = vmul.f32 %v1588_v1, %v3668_v8  ;;  %v1655_v4 = vmul.f32 %v1588_v1, %v3669_v7  ;;  %v1656_v28 = vmul.f32 %v1588_v1, %v3670_v30 }
 0x2b4   : > { %v1657_v23 = vmul.f32 %v1588_v1, %v3671_v17  ;;  %v1658_v37 = vmul.f32 %v1588_v1, %v3672_v62  ;;  %v1659_v10 = vmul.f32 %v1588_v1, %v3673_v32  ;;  %v1773_v13 = vadd.f32 %v1708_v45, %v1653_v6  ;;  %v3681_v17 = vld [vmem:[#allocation17_spill] sm:$0xff] }
 0x2b5   : > { %v1774_v14 = vadd.f32 %v1708_v45, %v1654_v60  ;;  %v1775_v35 = vadd.f32 %v1708_v45, %v1655_v4  ;;  %v1639_v51 = vmul.f32 %v1578_v43, %v3674_v44  ;;  %v1776_v56 = vadd.f32 %v1708_v45, %v1656_v28  ;;  %v3685_v44 = vld [vmem:[#allocation32_spill] sm:$0xff] }
 0x2b6   : > { %v1777_v21 = vadd.f32 %v1708_v45, %v1657_v23  ;;  %v1778_v16 = vadd.f32 %v1708_v45, %v1658_v37  ;;  %v1779_v55 = vadd.f32 %v1708_v45, %v1659_v10  ;;  %v1843_v19 = vmax.f32 %v1773_v13, 0.0  ;;  %v1693_v53 = vpop.permute.xlu1 %1692  ;;  %v3683_v10 = vld [vmem:[#allocation19_spill] sm:$0xff] }
 0x2b7   : > { %v1844_v57 = vmax.f32 %v1774_v14, 0.0  ;;  %v1845_v63 = vmax.f32 %v1775_v35, 0.0  ;;  %v1640_v11 = vmul.f32 %v1578_v43, %v3675_v47  ;;  %v1846_v24 = vmax.f32 %v1776_v56, 0.0  ;;  %v3684_v14 = vld [vmem:[#allocation21_spill] sm:$0xff] }
 0x2b8   : > { %v1847_v26 = vmax.f32 %v1777_v21, 0.0  ;;  %v1848_v33 = vmax.f32 %v1778_v16, 0.0  ;;  %v1849_v20 = vmax.f32 %v1779_v55, 0.0  ;;  %1913 = vst [vmem:[%s3410_s8 + $0x1f8] sm:$0xff] %v1843_v19  ;;  %v1641_v54 = vmul.f32 %v1578_v43, %v3676_v31  ;;  %v3686_v56 = vld [vmem:[#allocation33_spill] sm:$0xff]  ;;  %v3687_v16 = vld [vmem:[#allocation34_spill] sm:$0xff] }
 0x2b9   : > { %1914 = vst [vmem:[%s3410_s8 + $0x200] sm:$0xff] %v1844_v57  ;;  %1915 = vst [vmem:[%s3410_s8 + $0x208] sm:$0xff] %v1845_v63  ;;  %v1642_v58 = vmul.f32 %v1578_v43, %v3677_v34  ;;  %v1643_v5 = vmul.f32 %v1578_v43, %v3678_v41  ;;  %v1644_v1 = vmul.f32 %v1578_v43, %v3679_v39 }
 0x2ba   : > { %1916 = vst [vmem:[%s3410_s8 + $0x210] sm:$0xff] %v1846_v24  ;;  %1917 = vst [vmem:[%s3410_s8 + $0x218] sm:$0xff] %v1847_v26  ;;  %v1645_v27 = vmul.f32 %v1578_v43, %v3680_v9  ;;  %v1759_v46 = vadd.f32 %v3472_v38, %v1639_v51  ;;  %v1760_v2 = vadd.f32 %v3472_v38, %v1640_v11  ;;  %v1583_v15 = vpop.permute.xlu1 %1582 }
 0x2bb   : > { %1918 = vst [vmem:[%s3410_s8 + $0x220] sm:$0xff] %v1848_v33  ;;  %1919 = vst.msk [vmem:[%s3410_s8 + $0x228] sm:$0xff] %vm1174_vm1, %v1849_v20  ;;  %v1752_v36 = vadd.f32 %v1693_v53, %v1632_v49  ;;  %v1761_v52 = vadd.f32 %v3472_v38, %v1641_v54  ;;  %v1762_v61 = vadd.f32 %v3472_v38, %v1642_v58 }
 0x2bc   : > { %v1763_v48 = vadd.f32 %v3472_v38, %v1643_v5  ;;  %v1764_v3 = vadd.f32 %v3472_v38, %v1644_v1  ;;  %v1765_v18 = vadd.f32 %v3472_v38, %v1645_v27  ;;  %v1829_v22 = vmax.f32 %v1759_v46, 0.0 }
 0x2bd   : > { %v1830_v12 = vmax.f32 %v1760_v2, 0.0  ;;  %v1753_v50 = vadd.f32 %v1693_v53, %v1633_v29  ;;  %v1831_v49 = vmax.f32 %v1761_v52, 0.0  ;;  %v1832_v6 = vmax.f32 %v1762_v61, 0.0 }
 0x2be   : > { %v1833_v8 = vmax.f32 %v1763_v48, 0.0  ;;  %v1834_v60 = vmax.f32 %v1764_v3, 0.0  ;;  %v1835_v7 = vmax.f32 %v1765_v18, 0.0  ;;  %1899 = vst [vmem:[%s3410_s8 + $0x188] sm:$0xff] %v1829_v22  ;;  %v1754_v4 = vadd.f32 %v1693_v53, %v3490_v59  ;;  %v1703_v62 = vpop.permute.xlu1 %1702 }
 0x2bf   : > { %1900 = vst [vmem:[%s3410_s8 + $0x190] sm:$0xff] %v1830_v12  ;;  %v1755_v45 = vadd.f32 %v1693_v53, %v3493_v25  ;;  %v1756_v43 = vadd.f32 %v1693_v53, %v3496_v0  ;;  %1901 = vst [vmem:[%s3410_s8 + $0x198] sm:$0xff] %v1831_v49  ;;  %v1757_v38 = vadd.f32 %v1693_v53, %v3499_v40  ;;  %v1822_v30 = vmax.f32 %v1752_v36, 0.0  ;;  %v3682_v40 = vld [vmem:[#allocation18_spill] sm:$0xff] }
 0x2c0   : > { %1902 = vst [vmem:[%s3410_s8 + $0x1a0] sm:$0xff] %v1832_v6  ;;  %1903 = vst [vmem:[%s3410_s8 + $0x1a8] sm:$0xff] %v1833_v8  ;;  %v1758_v29 = vadd.f32 %v1693_v53, %v3505_v42  ;;  %v1823_v28 = vmax.f32 %v1753_v50, 0.0  ;;  %v1824_v59 = vmax.f32 %v1754_v4, 0.0  ;;  %v1646_v23 = vmul.f32 %v1583_v15, %v3681_v17 }
 0x2c1   : > { %1904 = vst [vmem:[%s3410_s8 + $0x1b0] sm:$0xff] %v1834_v60  ;;  %1905 = vst.msk [vmem:[%s3410_s8 + $0x1b8] sm:$0xff] %vm1174_vm1, %v1835_v7  ;;  %v1825_v25 = vmax.f32 %v1755_v45, 0.0  ;;  %v1826_v0 = vmax.f32 %v1756_v43, 0.0  ;;  %v1827_v37 = vmax.f32 %v1757_v38, 0.0  ;;  %v1647_v42 = vmul.f32 %v1583_v15, %v3682_v40 }
 0x2c2   : > { %v1828_v32 = vmax.f32 %v1758_v29, 0.0  ;;  %1892 = vst [vmem:[%s3410_s8 + $0x150] sm:$0xff] %v1822_v30  ;;  %1893 = vst [vmem:[%s3410_s8 + $0x158] sm:$0xff] %v1823_v28  ;;  %v1648_v13 = vmul.f32 %v1583_v15, %v3683_v10  ;;  %v1649_v35 = vmul.f32 %v1583_v15, %v3684_v14  ;;  %v1650_v51 = vmul.f32 %v1583_v15, %v3685_v44 }
 0x2c3   : > { %1894 = vst [vmem:[%s3410_s8 + $0x160] sm:$0xff] %v1824_v59  ;;  %1895 = vst [vmem:[%s3410_s8 + $0x168] sm:$0xff] %v1825_v25  ;;  %v1651_v21 = vmul.f32 %v1583_v15, %v3686_v56  ;;  %v1652_v55 = vmul.f32 %v1583_v15, %v3687_v16  ;;  %v1766_v19 = vadd.f32 %v1703_v62, %v1646_v23 }
 0x2c4   : > { %1896 = vst [vmem:[%s3410_s8 + $0x170] sm:$0xff] %v1826_v0  ;;  %1897 = vst [vmem:[%s3410_s8 + $0x178] sm:$0xff] %v1827_v37  ;;  %v1767_v57 = vadd.f32 %v1703_v62, %v1647_v42  ;;  %v1768_v63 = vadd.f32 %v1703_v62, %v1648_v13  ;;  %v1769_v47 = vadd.f32 %v1703_v62, %v1649_v35 }
 0x2c5   : > { %1898 = vst.msk [vmem:[%s3410_s8 + $0x180] sm:$0xff] %vm1174_vm1, %v1828_v32  ;;  %v1770_v11 = vadd.f32 %v1703_v62, %v1650_v51  ;;  %v1771_v53 = vadd.f32 %v1703_v62, %v1651_v21  ;;  %v1772_v24 = vadd.f32 %v1703_v62, %v1652_v55  ;;  %v1836_v26 = vmax.f32 %v1766_v19, 0.0 }
 0x2c6   : > { %v1837_v33 = vmax.f32 %v1767_v57, 0.0  ;;  %v1838_v20 = vmax.f32 %v1768_v63, 0.0  ;;  %v1839_v31 = vmax.f32 %v1769_v47, 0.0 }
 0x2c7   : > { %v1840_v54 = vmax.f32 %v1770_v11, 0.0  ;;  %v1841_v34 = vmax.f32 %v1771_v53, 0.0  ;;  %v1842_v58 = vmax.f32 %v1772_v24, 0.0  ;;  %1906 = vst [vmem:[%s3410_s8 + $0x1c0] sm:$0xff] %v1836_v26 }
 0x2c8   : > { %1907 = vst [vmem:[%s3410_s8 + $0x1c8] sm:$0xff] %v1837_v33  ;;  %1908 = vst [vmem:[%s3410_s8 + $0x1d0] sm:$0xff] %v1838_v20 }
 0x2c9   : > { %1909 = vst [vmem:[%s3410_s8 + $0x1d8] sm:$0xff] %v1839_v31  ;;  %1910 = vst [vmem:[%s3410_s8 + $0x1e0] sm:$0xff] %v1840_v54 }
 0x2ca   : > { %1911 = vst [vmem:[%s3410_s8 + $0x1e8] sm:$0xff] %v1841_v34  ;;  %1912 = vst.msk [vmem:[%s3410_s8 + $0x1f0] sm:$0xff] %vm1174_vm1, %v1842_v58 }
 0x2cb PF: > { %s14_s15 = sadd.s32 1, %s2098_s15  }
 0x2cc   : > { %p11_p4 = scmp.ge.s32.totalorder %s14_s15, 5  }
 0x2ce   :  { %13 = sbr.rel (!%p11_p4) target bundleno = 1 (0x1), region = 72 }

</bundles_post_ra>
